<compile_context>
chip_gen: v5e
topology: v5e:2x2
jax: 0.10.0
libtpu: 0.0.40
codegen_flags: <defaults>
</compile_context>

<pallas_src>
import functools
import math

import jax
import jax.numpy as jnp
from jax.experimental import pallas as pl
from jax.experimental.pallas import tpu as pltpu

# ---- scaled-down BERT config (bert-base would be 12 layers / 768 hidden / 12 heads / 3072 ffn) ----
VOCAB = 128
HIDDEN = 128            # multiple of 128 -> lane-dense matmuls / stores
LAYERS = 2
HEADS = 4
HEAD_DIM = HIDDEN // HEADS
INTERMEDIATE = 256      # multiple of 128
MAX_POS = 16
TYPE_VOCAB = 2
NUM_CLASSES = 8         # stands in for len(task_data['techniques_encoded'].iloc[0])
LN_EPS = 1e-12


# ----------------------------- in-kernel helpers -----------------------------

def _layernorm(x, g, b):
    mean = jnp.mean(x, axis=-1, keepdims=True)
    var = jnp.mean(jnp.square(x - mean), axis=-1, keepdims=True)
    return (x - mean) * jax.lax.rsqrt(var + LN_EPS) * g + b


def _gelu(x):
    # TODO(synk): HF BERT uses exact erf-GELU; tanh approximation used here for guaranteed Mosaic lowering.
    c = jnp.float32(math.sqrt(2.0 / math.pi))
    return 0.5 * x * (1.0 + jnp.tanh(c * (x + 0.044715 * x * x * x)))


# ----------------------------- Pallas kernels -----------------------------

def _layernorm_kernel(x_ref, g_ref, b_ref, o_ref):
    """Embedding LayerNorm (no residual)."""
    o_ref[...] = _layernorm(x_ref[...], g_ref[...], b_ref[...]).astype(o_ref.dtype)


def pallas_layernorm(x, gamma, beta):
    M, H = x.shape
    return pl.pallas_call(
        _layernorm_kernel,
        out_shape=jax.ShapeDtypeStruct((M, H), jnp.float32),
        grid=(1,),
        in_specs=[
            pl.BlockSpec((M, H), lambda i: (0, 0)),
            pl.BlockSpec((1, H), lambda i: (0, 0)),
            pl.BlockSpec((1, H), lambda i: (0, 0)),
        ],
        out_specs=pl.BlockSpec((M, H), lambda i: (0, 0)),
    )(x, gamma, beta)


def _bert_layer_kernel(h_ref, mask_ref,
                       wqkv_ref, bqkv_ref, wo_ref, bo_ref, ln1g_ref, ln1b_ref,
                       wff1_ref, bff1_ref, wff2_ref, bff2_ref, ln2g_ref, ln2b_ref,
                       o_ref, *, heads, head_dim, scale):
    """One full transformer encoder layer for one batch element, fully resident in VMEM.

    h block: [1, S, H]; mask block: [1, 1, S] (additive); weights resident across grid.
    """
    H = heads * head_dim
    x = h_ref[0]                                            # [S, H] f32
    x_bf = x.astype(jnp.bfloat16)

    # --- fused QKV projection (one lane-dense [H, 3H] matmul) ---
    qkv = jnp.dot(x_bf, wqkv_ref[...], preferred_element_type=jnp.float32) + bqkv_ref[...]
    q = qkv[:, :H]
    k = qkv[:, H:2 * H]
    v = qkv[:, 2 * H:]

    mask = mask_ref[0]                                      # [1, S] additive mask

    # --- per-head attention (static unrolled loop; no cross-kernel transposes) ---
    ctx_heads = []
    for hh in range(heads):
        sl = slice(hh * head_dim, (hh + 1) * head_dim)
        qh = q[:, sl].astype(jnp.bfloat16)                  # [S, Dh]
        kh = k[:, sl].astype(jnp.bfloat16)
        vh = v[:, sl].astype(jnp.bfloat16)
        s = jax.lax.dot_general(qh, kh, (((1,), (1,)), ((), ())),
                                preferred_element_type=jnp.float32) * scale   # [S, S]
        s = s + mask                                        # broadcast over query rows
        s_max = jnp.max(s, axis=-1, keepdims=True)
        p = jnp.exp(s - s_max)
        p = p * pl.reciprocal(jnp.sum(p, axis=-1, keepdims=True), approx=True)
        ctx_heads.append(jnp.dot(p.astype(jnp.bfloat16), vh,
                                 preferred_element_type=jnp.float32))         # [S, Dh]
    ctx = jnp.concatenate(ctx_heads, axis=-1)               # [S, H]

    # --- attention output projection + residual + LN ---
    attn_out = jnp.dot(ctx.astype(jnp.bfloat16), wo_ref[...],
                       preferred_element_type=jnp.float32) + bo_ref[...]
    h1 = _layernorm(attn_out + x, ln1g_ref[...], ln1b_ref[...])

    # --- feed forward (FF1 + GELU + FF2) + residual + LN ---
    ff = jnp.dot(h1.astype(jnp.bfloat16), wff1_ref[...],
                 preferred_element_type=jnp.float32) + bff1_ref[...]
    ff = _gelu(ff)
    ff = jnp.dot(ff.astype(jnp.bfloat16), wff2_ref[...],
                 preferred_element_type=jnp.float32) + bff2_ref[...]
    h2 = _layernorm(ff + h1, ln2g_ref[...], ln2b_ref[...])

    o_ref[0] = h2.astype(o_ref.dtype)


def _resident_spec(shape):
    """Full-array block, same block for every grid step (weights stay in VMEM)."""
    return pl.BlockSpec(shape, lambda b: (0,) * len(shape))


def pallas_bert_layer(h, add_mask, lp):
    B, S, H = h.shape
    scale = 1.0 / math.sqrt(HEAD_DIM)
    kern = functools.partial(_bert_layer_kernel, heads=HEADS, head_dim=HEAD_DIM, scale=scale)
    return pl.pallas_call(
        kern,
        out_shape=jax.ShapeDtypeStruct((B, S, H), jnp.float32),
        grid=(B,),
        in_specs=[
            pl.BlockSpec((1, S, H), lambda b: (b, 0, 0)),
            pl.BlockSpec((1, 1, S), lambda b: (b, 0, 0)),
            _resident_spec((H, 3 * H)), _resident_spec((1, 3 * H)),
            _resident_spec((H, H)), _resident_spec((1, H)),
            _resident_spec((1, H)), _resident_spec((1, H)),
            _resident_spec((H, INTERMEDIATE)), _resident_spec((1, INTERMEDIATE)),
            _resident_spec((INTERMEDIATE, H)), _resident_spec((1, H)),
            _resident_spec((1, H)), _resident_spec((1, H)),
        ],
        out_specs=pl.BlockSpec((1, S, H), lambda b: (b, 0, 0)),
        compiler_params=pltpu.CompilerParams(dimension_semantics=("parallel",)),
    )(h, add_mask,
      lp["wqkv"], lp["bqkv"], lp["wo"], lp["bo"], lp["ln1_g"], lp["ln1_b"],
      lp["wff1"], lp["bff1"], lp["wff2"], lp["bff2"], lp["ln2_g"], lp["ln2_b"])


def _pooler_cls_kernel(cls_ref, wp_ref, bp_ref, wc_ref, bc_ref, o_ref):
    """pooled = tanh(cls @ Wp + bp); logits = pooled @ Wc + bc (dropout 0.3 = identity at eval)."""
    pooled = jnp.tanh(jnp.dot(cls_ref[...].astype(jnp.bfloat16), wp_ref[...],
                              preferred_element_type=jnp.float32) + bp_ref[...])
    logits = jnp.dot(pooled.astype(jnp.bfloat16), wc_ref[...],
                     preferred_element_type=jnp.float32) + bc_ref[...]
    o_ref[...] = logits.astype(o_ref.dtype)


def pallas_pooler_classifier(cls_tok, wp, bp, wc, bc):
    B, H = cls_tok.shape
    C = wc.shape[1]
    return pl.pallas_call(
        _pooler_cls_kernel,
        out_shape=jax.ShapeDtypeStruct((B, C), jnp.float32),
        grid=(1,),
        in_specs=[
            pl.BlockSpec((B, H), lambda i: (0, 0)),
            pl.BlockSpec((H, H), lambda i: (0, 0)),
            pl.BlockSpec((1, H), lambda i: (0, 0)),
            pl.BlockSpec((H, C), lambda i: (0, 0)),
            pl.BlockSpec((1, C), lambda i: (0, 0)),
        ],
        out_specs=pl.BlockSpec((B, C), lambda i: (0, 0)),
    )(cls_tok, wp, bp, wc, bc)


# ----------------------------- parameters -----------------------------

def init_params(key):
    keys = iter(jax.random.split(key, 64))

    def w(shape, scale=0.02, dtype=jnp.bfloat16):
        return (jax.random.normal(next(keys), shape, jnp.float32) * scale).astype(dtype)

    def zeros(shape):
        return jnp.zeros(shape, jnp.float32)

    def ones(shape):
        return jnp.ones(shape, jnp.float32)

    params = {
        # embedding tables stay f32 (gathered in XLA, LN in f32)
        "word_emb": w((VOCAB, HIDDEN), dtype=jnp.float32),
        "pos_emb": w((MAX_POS, HIDDEN), dtype=jnp.float32),
        "type_emb": w((TYPE_VOCAB, HIDDEN), dtype=jnp.float32),
        "emb_ln_g": ones((1, HIDDEN)), "emb_ln_b": zeros((1, HIDDEN)),
        # pooler + classifier (matmul weights bf16, biases f32)
        "pool_w": w((HIDDEN, HIDDEN)), "pool_b": zeros((1, HIDDEN)),
        "cls_w": w((HIDDEN, NUM_CLASSES)), "cls_b": zeros((1, NUM_CLASSES)),
        "layers": [],
    }
    for _ in range(LAYERS):
        params["layers"].append({
            "wqkv": w((HIDDEN, 3 * HIDDEN)), "bqkv": zeros((1, 3 * HIDDEN)),
            "wo": w((HIDDEN, HIDDEN)), "bo": zeros((1, HIDDEN)),
            "ln1_g": ones((1, HIDDEN)), "ln1_b": zeros((1, HIDDEN)),
            "wff1": w((HIDDEN, INTERMEDIATE)), "bff1": zeros((1, INTERMEDIATE)),
            "wff2": w((INTERMEDIATE, HIDDEN)), "bff2": zeros((1, HIDDEN)),
            "ln2_g": ones((1, HIDDEN)), "ln2_b": zeros((1, HIDDEN)),
        })
    return params


# ----------------------------- forward pass -----------------------------

def mbert_forward(params, ids, attention_mask, token_type_ids):
    """Equivalent of mBERTBase.forward(ids, attention_mask, token_type_ids) at inference."""
    B, S = ids.shape

    # --- embeddings: table gathers stay in XLA (no clean Pallas equivalent at this size) ---
    pos_ids = jnp.arange(S, dtype=jnp.int32)[None, :]
    emb = (jnp.take(params["word_emb"], ids, axis=0)
           + jnp.take(params["pos_emb"], pos_ids, axis=0)
           + jnp.take(params["type_emb"], token_type_ids, axis=0))
    h2d = pallas_layernorm(emb.reshape(B * S, HIDDEN), params["emb_ln_g"], params["emb_ln_b"])
    # embedding dropout (p=0.1) is identity at inference
    h = h2d.reshape(B, S, HIDDEN)

    # BERT extended additive attention mask
    add_mask = ((1.0 - attention_mask.astype(jnp.float32)) * (-1e9)).reshape(B, 1, S)

    # --- one fused Pallas kernel per transformer layer ---
    for lp in params["layers"]:
        h = pallas_bert_layer(h, add_mask, lp)

    # --- pooler (tanh Linear over [CLS]) + Dropout(0.3, identity at eval) + classifier, fused ---
    # TODO(synk): training-mode dropout (Bernoulli masking via pltpu.prng_*) not implemented; eval semantics only.
    cls_tok = h[:, 0, :]
    logits = pallas_pooler_classifier(cls_tok, params["pool_w"], params["pool_b"],
                                      params["cls_w"], params["cls_b"])
    return logits


# ----------------------------- demo -----------------------------

if __name__ == "__main__":
    key = jax.random.PRNGKey(0)
    pkey, ikey = jax.random.split(key)
    params = init_params(pkey)

    B, S = 2, 8
    ids = jax.random.randint(ikey, (B, S), 0, VOCAB, dtype=jnp.int32)
    attention_mask = jnp.concatenate(
        [jnp.ones((B, 6), jnp.int32), jnp.zeros((B, 2), jnp.int32)], axis=1)
    token_type_ids = jnp.zeros((B, S), jnp.int32)

    logits = jax.jit(mbert_forward)(params, ids, attention_mask, token_type_ids)
    logits = jax.block_until_ready(logits)
    assert logits.shape == (B, NUM_CLASSES)
    assert bool(jnp.all(jnp.isfinite(logits)))
    print("KERNEL_OK")
</pallas_src>

<mosaic_0001>
module attributes {stable_mosaic.version = 11 : i64} {
  func.func @_pooler_cls_kernel(%arg0: i32, %arg1: memref<2x128xf32, #tpu.memory_space<vmem>>, %arg2: memref<128x128xbf16, #tpu.memory_space<vmem>>, %arg3: memref<1x128xf32, #tpu.memory_space<vmem>>, %arg4: memref<128x8xbf16, #tpu.memory_space<vmem>>, %arg5: memref<1x8xf32, #tpu.memory_space<vmem>>, %arg6: memref<2x8xf32, #tpu.memory_space<vmem>>) attributes {dimension_semantics = [#tpu.dimension_semantics<arbitrary>], iteration_bounds = array<i64: 1>, scalar_prefetch = 0 : i64, scratch_operands = 0 : i64, tpu.core_type = #tpu.core_type<tc>, window_params = [{pipeline_mode = #tpu.pipeline_mode<synchronous>, transform_indices = @transform_0, window_bounds = array<i64: 2, 128>}, {pipeline_mode = #tpu.pipeline_mode<synchronous>, transform_indices = @transform_1, window_bounds = array<i64: 128, 128>}, {pipeline_mode = #tpu.pipeline_mode<synchronous>, transform_indices = @transform_2, window_bounds = array<i64: 1, 128>}, {pipeline_mode = #tpu.pipeline_mode<synchronous>, transform_indices = @transform_3, window_bounds = array<i64: 128, 8>}, {pipeline_mode = #tpu.pipeline_mode<synchronous>, transform_indices = @transform_4, window_bounds = array<i64: 1, 8>}, {pipeline_mode = #tpu.pipeline_mode<synchronous>, transform_indices = @transform_5, window_bounds = array<i64: 2, 8>}]} {
    %c0 = arith.constant 0 : index
    %c0_0 = arith.constant 0 : index
    %0 = vector.load %arg1[%c0, %c0_0] : memref<2x128xf32, #tpu.memory_space<vmem>>, vector<2x128xf32>
    %1 = arith.truncf %0 : vector<2x128xf32> to vector<2x128xbf16>
    %c0_1 = arith.constant 0 : index
    %c0_2 = arith.constant 0 : index
    %2 = vector.load %arg2[%c0_1, %c0_2] : memref<128x128xbf16, #tpu.memory_space<vmem>>, vector<128x128xbf16>
    %cst = arith.constant dense<0.000000e+00> : vector<2x128xf32>
    %3 = tpu.matmul %1, %2, %cst {dimension_numbers = #tpu.dot_dimension_numbers<[1], [0], [0], [1], [0, 0, 1, 1], [], []>} : vector<2x128xbf16>, vector<128x128xbf16>, vector<2x128xf32> -> vector<2x128xf32>
    %c0_3 = arith.constant 0 : index
    %c0_4 = arith.constant 0 : index
    %4 = vector.load %arg3[%c0_3, %c0_4] : memref<1x128xf32, #tpu.memory_space<vmem>>, vector<1x128xf32>
    %5 = vector.broadcast %4 : vector<1x128xf32> to vector<2x128xf32>
    %6 = arith.addf %3, %5 : vector<2x128xf32>
    %7 = math.tanh %6 : vector<2x128xf32>
    %8 = arith.truncf %7 : vector<2x128xf32> to vector<2x128xbf16>
    %c0_5 = arith.constant 0 : index
    %c0_6 = arith.constant 0 : index
    %9 = vector.load %arg4[%c0_5, %c0_6] : memref<128x8xbf16, #tpu.memory_space<vmem>>, vector<128x8xbf16>
    %cst_7 = arith.constant dense<0.000000e+00> : vector<2x8xf32>
    %10 = tpu.matmul %8, %9, %cst_7 {dimension_numbers = #tpu.dot_dimension_numbers<[1], [0], [0], [1], [0, 0, 1, 1], [], []>} : vector<2x128xbf16>, vector<128x8xbf16>, vector<2x8xf32> -> vector<2x8xf32>
    %c0_8 = arith.constant 0 : index
    %c0_9 = arith.constant 0 : index
    %11 = vector.load %arg5[%c0_8, %c0_9] : memref<1x8xf32, #tpu.memory_space<vmem>>, vector<1x8xf32>
    %12 = vector.broadcast %11 : vector<1x8xf32> to vector<2x8xf32>
    %13 = arith.addf %10, %12 : vector<2x8xf32>
    %c0_10 = arith.constant 0 : index
    %c0_11 = arith.constant 0 : index
    %14 = vector.load %arg6[%c0_10, %c0_11] : memref<2x8xf32, #tpu.memory_space<vmem>>, vector<2x8xf32>
    tpu.vector_store %arg6[%c0_10, %c0_11], %13 {strides = array<i32>} : memref<2x8xf32, #tpu.memory_space<vmem>>, vector<2x8xf32>,
    return
  }
  func.func @transform_0(%arg0: i32) -> (i32, i32) {
    %c0_i32 = arith.constant 0 : i32
    %c0_i32_0 = arith.constant 0 : i32
    %c0_i32_1 = arith.constant 0 : i32
    return %c0_i32, %c0_i32_0 : i32, i32
  }
  func.func @transform_1(%arg0: i32) -> (i32, i32) {
    %c0_i32 = arith.constant 0 : i32
    %c0_i32_0 = arith.constant 0 : i32
    %c0_i32_1 = arith.constant 0 : i32
    return %c0_i32, %c0_i32_0 : i32, i32
  }
  func.func @transform_2(%arg0: i32) -> (i32, i32) {
    %c0_i32 = arith.constant 0 : i32
    %c0_i32_0 = arith.constant 0 : i32
    %c0_i32_1 = arith.constant 0 : i32
    return %c0_i32, %c0_i32_0 : i32, i32
  }
  func.func @transform_3(%arg0: i32) -> (i32, i32) {
    %c0_i32 = arith.constant 0 : i32
    %c0_i32_0 = arith.constant 0 : i32
    %c0_i32_1 = arith.constant 0 : i32
    return %c0_i32, %c0_i32_0 : i32, i32
  }
  func.func @transform_4(%arg0: i32) -> (i32, i32) {
    %c0_i32 = arith.constant 0 : i32
    %c0_i32_0 = arith.constant 0 : i32
    %c0_i32_1 = arith.constant 0 : i32
    return %c0_i32, %c0_i32_0 : i32, i32
  }
  func.func @transform_5(%arg0: i32) -> (i32, i32) {
    %c0_i32 = arith.constant 0 : i32
    %c0_i32_0 = arith.constant 0 : i32
    %c0_i32_1 = arith.constant 0 : i32
    return %c0_i32, %c0_i32_0 : i32, i32
  }
}

module attributes {stable_mosaic.version = 11 : i64} {
  func.func @_bert_layer_kernel(%arg0: i32, %arg1: memref<1x8x128xf32, #tpu.memory_space<vmem>>, %arg2: memref<1x1x8xf32, #tpu.memory_space<vmem>>, %arg3: memref<128x384xbf16, #tpu.memory_space<vmem>>, %arg4: memref<1x384xf32, #tpu.memory_space<vmem>>, %arg5: memref<128x128xbf16, #tpu.memory_space<vmem>>, %arg6: memref<1x128xf32, #tpu.memory_space<vmem>>, %arg7: memref<1x128xf32, #tpu.memory_space<vmem>>, %arg8: memref<1x128xf32, #tpu.memory_space<vmem>>, %arg9: memref<128x256xbf16, #tpu.memory_space<vmem>>, %arg10: memref<1x256xf32, #tpu.memory_space<vmem>>, %arg11: memref<256x128xbf16, #tpu.memory_space<vmem>>, %arg12: memref<1x128xf32, #tpu.memory_space<vmem>>, %arg13: memref<1x128xf32, #tpu.memory_space<vmem>>, %arg14: memref<1x128xf32, #tpu.memory_space<vmem>>, %arg15: memref<1x8x128xf32, #tpu.memory_space<vmem>>) attributes {dimension_semantics = [#tpu.dimension_semantics<parallel>], iteration_bounds = array<i64: 2>, scalar_prefetch = 0 : i64, scratch_operands = 0 : i64, tpu.core_type = #tpu.core_type<tc>, window_params = [{transform_indices = @transform_0, window_bounds = array<i64: 1, 8, 128>}, {transform_indices = @transform_1, window_bounds = array<i64: 1, 1, 8>}, {pipeline_mode = #tpu.pipeline_mode<synchronous>, transform_indices = @transform_2, window_bounds = array<i64: 128, 384>}, {pipeline_mode = #tpu.pipeline_mode<synchronous>, transform_indices = @transform_3, window_bounds = array<i64: 1, 384>}, {pipeline_mode = #tpu.pipeline_mode<synchronous>, transform_indices = @transform_4, window_bounds = array<i64: 128, 128>}, {pipeline_mode = #tpu.pipeline_mode<synchronous>, transform_indices = @transform_5, window_bounds = array<i64: 1, 128>}, {pipeline_mode = #tpu.pipeline_mode<synchronous>, transform_indices = @transform_6, window_bounds = array<i64: 1, 128>}, {pipeline_mode = #tpu.pipeline_mode<synchronous>, transform_indices = @transform_7, window_bounds = array<i64: 1, 128>}, {pipeline_mode = #tpu.pipeline_mode<synchronous>, transform_indices = @transform_8, window_bounds = array<i64: 128, 256>}, {pipeline_mode = #tpu.pipeline_mode<synchronous>, transform_indices = @transform_9, window_bounds = array<i64: 1, 256>}, {pipeline_mode = #tpu.pipeline_mode<synchronous>, transform_indices = @transform_10, window_bounds = array<i64: 256, 128>}, {pipeline_mode = #tpu.pipeline_mode<synchronous>, transform_indices = @transform_11, window_bounds = array<i64: 1, 128>}, {pipeline_mode = #tpu.pipeline_mode<synchronous>, transform_indices = @transform_12, window_bounds = array<i64: 1, 128>}, {pipeline_mode = #tpu.pipeline_mode<synchronous>, transform_indices = @transform_13, window_bounds = array<i64: 1, 128>}, {transform_indices = @transform_14, window_bounds = array<i64: 1, 8, 128>}]} {
    %c0 = arith.constant 0 : index
    %c0_0 = arith.constant 0 : index
    %c0_1 = arith.constant 0 : index
    %0 = vector.load %arg1[%c0, %c0_0, %c0_1] : memref<1x8x128xf32, #tpu.memory_space<vmem>>, vector<1x8x128xf32>
    %1 = vector.shape_cast %0 : vector<1x8x128xf32> to vector<8x128xf32>
    %2 = arith.truncf %1 : vector<8x128xf32> to vector<8x128xbf16>
    %c0_2 = arith.constant 0 : index
    %c0_3 = arith.constant 0 : index
    %3 = vector.load %arg3[%c0_2, %c0_3] : memref<128x384xbf16, #tpu.memory_space<vmem>>, vector<128x384xbf16>
    %cst = arith.constant dense<0.000000e+00> : vector<8x384xf32>
    %4 = tpu.matmul %2, %3, %cst {dimension_numbers = #tpu.dot_dimension_numbers<[1], [0], [0], [1], [0, 0, 1, 1], [], []>} : vector<8x128xbf16>, vector<128x384xbf16>, vector<8x384xf32> -> vector<8x384xf32>
    %c0_4 = arith.constant 0 : index
    %c0_5 = arith.constant 0 : index
    %5 = vector.load %arg4[%c0_4, %c0_5] : memref<1x384xf32, #tpu.memory_space<vmem>>, vector<1x384xf32>
    %6 = vector.broadcast %5 : vector<1x384xf32> to vector<8x384xf32>
    %7 = arith.addf %4, %6 : vector<8x384xf32>
    %8 = vector.extract_strided_slice %7 {offsets = [0, 0], sizes = [8, 128], strides = [1, 1]} : vector<8x384xf32> to vector<8x128xf32>
    %9 = vector.extract_strided_slice %7 {offsets = [0, 128], sizes = [8, 128], strides = [1, 1]} : vector<8x384xf32> to vector<8x128xf32>
    %10 = vector.extract_strided_slice %7 {offsets = [0, 256], sizes = [8, 128], strides = [1, 1]} : vector<8x384xf32> to vector<8x128xf32>
    %c0_6 = arith.constant 0 : index
    %c0_7 = arith.constant 0 : index
    %c0_8 = arith.constant 0 : index
    %11 = vector.load %arg2[%c0_6, %c0_7, %c0_8] : memref<1x1x8xf32, #tpu.memory_space<vmem>>, vector<1x1x8xf32>
    %12 = vector.shape_cast %11 : vector<1x1x8xf32> to vector<1x8xf32>
    %13 = vector.extract_strided_slice %8 {offsets = [0, 0], sizes = [8, 32], strides = [1, 1]} : vector<8x128xf32> to vector<8x32xf32>
    %14 = arith.truncf %13 : vector<8x32xf32> to vector<8x32xbf16>
    %15 = vector.extract_strided_slice %9 {offsets = [0, 0], sizes = [8, 32], strides = [1, 1]} : vector<8x128xf32> to vector<8x32xf32>
    %16 = arith.truncf %15 : vector<8x32xf32> to vector<8x32xbf16>
    %17 = vector.extract_strided_slice %10 {offsets = [0, 0], sizes = [8, 32], strides = [1, 1]} : vector<8x128xf32> to vector<8x32xf32>
    %18 = arith.truncf %17 : vector<8x32xf32> to vector<8x32xbf16>
    %cst_9 = arith.constant dense<0.000000e+00> : vector<8x8xf32>
    %19 = tpu.matmul %14, %16, %cst_9 {dimension_numbers = #tpu.dot_dimension_numbers<[1], [1], [0], [0], [0, 0, 1, 0], [], []>} : vector<8x32xbf16>, vector<8x32xbf16>, vector<8x8xf32> -> vector<8x8xf32>
    %cst_10 = arith.constant 0.176776692 : f32
    %20 = vector.broadcast %cst_10 : f32 to vector<8x8xf32>
    %21 = arith.mulf %19, %20 : vector<8x8xf32>
    %22 = vector.broadcast %12 : vector<1x8xf32> to vector<8x8xf32>
    %23 = arith.addf %21, %22 : vector<8x8xf32>
    %cst_11 = arith.constant dense<0xFF800000> : vector<8xf32>
    %24 = vector.multi_reduction <maximumf>, %23, %cst_11 [1] : vector<8x8xf32> to vector<8xf32>
    %25 = vector.shape_cast %24 : vector<8xf32> to vector<8x1xf32>
    %26 = vector.broadcast %25 : vector<8x1xf32> to vector<8x8xf32>
    %27 = arith.subf %23, %26 : vector<8x8xf32>
    %28 = math.exp %27 : vector<8x8xf32>
    %cst_12 = arith.constant dense<0.000000e+00> : vector<8xf32>
    %29 = vector.multi_reduction <add>, %28, %cst_12 [1] : vector<8x8xf32> to vector<8xf32>
    %30 = vector.shape_cast %29 : vector<8xf32> to vector<8x1xf32>
    %31 = tpu.reciprocal %30 {approx = true} : vector<8x1xf32> -> vector<8x1xf32>
    %32 = vector.broadcast %31 : vector<8x1xf32> to vector<8x8xf32>
    %33 = arith.mulf %28, %32 : vector<8x8xf32>
    %34 = arith.truncf %33 : vector<8x8xf32> to vector<8x8xbf16>
    %cst_13 = arith.constant dense<0.000000e+00> : vector<8x32xf32>
    %35 = tpu.matmul %34, %18, %cst_13 {dimension_numbers = #tpu.dot_dimension_numbers<[1], [0], [0], [1], [0, 0, 1, 1], [], []>} : vector<8x8xbf16>, vector<8x32xbf16>, vector<8x32xf32> -> vector<8x32xf32>
    %36 = vector.extract_strided_slice %8 {offsets = [0, 32], sizes = [8, 32], strides = [1, 1]} : vector<8x128xf32> to vector<8x32xf32>
    %37 = arith.truncf %36 : vector<8x32xf32> to vector<8x32xbf16>
    %38 = vector.extract_strided_slice %9 {offsets = [0, 32], sizes = [8, 32], strides = [1, 1]} : vector<8x128xf32> to vector<8x32xf32>
    %39 = arith.truncf %38 : vector<8x32xf32> to vector<8x32xbf16>
    %40 = vector.extract_strided_slice %10 {offsets = [0, 32], sizes = [8, 32], strides = [1, 1]} : vector<8x128xf32> to vector<8x32xf32>
    %41 = arith.truncf %40 : vector<8x32xf32> to vector<8x32xbf16>
    %cst_14 = arith.constant dense<0.000000e+00> : vector<8x8xf32>
    %42 = tpu.matmul %37, %39, %cst_14 {dimension_numbers = #tpu.dot_dimension_numbers<[1], [1], [0], [0], [0, 0, 1, 0], [], []>} : vector<8x32xbf16>, vector<8x32xbf16>, vector<8x8xf32> -> vector<8x8xf32>
    %cst_15 = arith.constant 0.176776692 : f32
    %43 = vector.broadcast %cst_15 : f32 to vector<8x8xf32>
    %44 = arith.mulf %42, %43 : vector<8x8xf32>
    %45 = vector.broadcast %12 : vector<1x8xf32> to vector<8x8xf32>
    %46 = arith.addf %44, %45 : vector<8x8xf32>
    %cst_16 = arith.constant dense<0xFF800000> : vector<8xf32>
    %47 = vector.multi_reduction <maximumf>, %46, %cst_16 [1] : vector<8x8xf32> to vector<8xf32>
    %48 = vector.shape_cast %47 : vector<8xf32> to vector<8x1xf32>
    %49 = vector.broadcast %48 : vector<8x1xf32> to vector<8x8xf32>
    %50 = arith.subf %46, %49 : vector<8x8xf32>
    %51 = math.exp %50 : vector<8x8xf32>
    %cst_17 = arith.constant dense<0.000000e+00> : vector<8xf32>
    %52 = vector.multi_reduction <add>, %51, %cst_17 [1] : vector<8x8xf32> to vector<8xf32>
    %53 = vector.shape_cast %52 : vector<8xf32> to vector<8x1xf32>
    %54 = tpu.reciprocal %53 {approx = true} : vector<8x1xf32> -> vector<8x1xf32>
    %55 = vector.broadcast %54 : vector<8x1xf32> to vector<8x8xf32>
    %56 = arith.mulf %51, %55 : vector<8x8xf32>
    %57 = arith.truncf %56 : vector<8x8xf32> to vector<8x8xbf16>
    %cst_18 = arith.constant dense<0.000000e+00> : vector<8x32xf32>
    %58 = tpu.matmul %57, %41, %cst_18 {dimension_numbers = #tpu.dot_dimension_numbers<[1], [0], [0], [1], [0, 0, 1, 1], [], []>} : vector<8x8xbf16>, vector<8x32xbf16>, vector<8x32xf32> -> vector<8x32xf32>
    %59 = vector.extract_strided_slice %8 {offsets = [0, 64], sizes = [8, 32], strides = [1, 1]} : vector<8x128xf32> to vector<8x32xf32>
    %60 = arith.truncf %59 : vector<8x32xf32> to vector<8x32xbf16>
    %61 = vector.extract_strided_slice %9 {offsets = [0, 64], sizes = [8, 32], strides = [1, 1]} : vector<8x128xf32> to vector<8x32xf32>
    %62 = arith.truncf %61 : vector<8x32xf32> to vector<8x32xbf16>
    %63 = vector.extract_strided_slice %10 {offsets = [0, 64], sizes = [8, 32], strides = [1, 1]} : vector<8x128xf32> to vector<8x32xf32>
    %64 = arith.truncf %63 : vector<8x32xf32> to vector<8x32xbf16>
    %cst_19 = arith.constant dense<0.000000e+00> : vector<8x8xf32>
    %65 = tpu.matmul %60, %62, %cst_19 {dimension_numbers = #tpu.dot_dimension_numbers<[1], [1], [0], [0], [0, 0, 1, 0], [], []>} : vector<8x32xbf16>, vector<8x32xbf16>, vector<8x8xf32> -> vector<8x8xf32>
    %cst_20 = arith.constant 0.176776692 : f32
    %66 = vector.broadcast %cst_20 : f32 to vector<8x8xf32>
    %67 = arith.mulf %65, %66 : vector<8x8xf32>
    %68 = vector.broadcast %12 : vector<1x8xf32> to vector<8x8xf32>
    %69 = arith.addf %67, %68 : vector<8x8xf32>
    %cst_21 = arith.constant dense<0xFF800000> : vector<8xf32>
    %70 = vector.multi_reduction <maximumf>, %69, %cst_21 [1] : vector<8x8xf32> to vector<8xf32>
    %71 = vector.shape_cast %70 : vector<8xf32> to vector<8x1xf32>
    %72 = vector.broadcast %71 : vector<8x1xf32> to vector<8x8xf32>
    %73 = arith.subf %69, %72 : vector<8x8xf32>
    %74 = math.exp %73 : vector<8x8xf32>
    %cst_22 = arith.constant dense<0.000000e+00> : vector<8xf32>
    %75 = vector.multi_reduction <add>, %74, %cst_22 [1] : vector<8x8xf32> to vector<8xf32>
    %76 = vector.shape_cast %75 : vector<8xf32> to vector<8x1xf32>
    %77 = tpu.reciprocal %76 {approx = true} : vector<8x1xf32> -> vector<8x1xf32>
    %78 = vector.broadcast %77 : vector<8x1xf32> to vector<8x8xf32>
    %79 = arith.mulf %74, %78 : vector<8x8xf32>
    %80 = arith.truncf %79 : vector<8x8xf32> to vector<8x8xbf16>
    %cst_23 = arith.constant dense<0.000000e+00> : vector<8x32xf32>
    %81 = tpu.matmul %80, %64, %cst_23 {dimension_numbers = #tpu.dot_dimension_numbers<[1], [0], [0], [1], [0, 0, 1, 1], [], []>} : vector<8x8xbf16>, vector<8x32xbf16>, vector<8x32xf32> -> vector<8x32xf32>
    %82 = vector.extract_strided_slice %8 {offsets = [0, 96], sizes = [8, 32], strides = [1, 1]} : vector<8x128xf32> to vector<8x32xf32>
    %83 = arith.truncf %82 : vector<8x32xf32> to vector<8x32xbf16>
    %84 = vector.extract_strided_slice %9 {offsets = [0, 96], sizes = [8, 32], strides = [1, 1]} : vector<8x128xf32> to vector<8x32xf32>
    %85 = arith.truncf %84 : vector<8x32xf32> to vector<8x32xbf16>
    %86 = vector.extract_strided_slice %10 {offsets = [0, 96], sizes = [8, 32], strides = [1, 1]} : vector<8x128xf32> to vector<8x32xf32>
    %87 = arith.truncf %86 : vector<8x32xf32> to vector<8x32xbf16>
    %cst_24 = arith.constant dense<0.000000e+00> : vector<8x8xf32>
    %88 = tpu.matmul %83, %85, %cst_24 {dimension_numbers = #tpu.dot_dimension_numbers<[1], [1], [0], [0], [0, 0, 1, 0], [], []>} : vector<8x32xbf16>, vector<8x32xbf16>, vector<8x8xf32> -> vector<8x8xf32>
    %cst_25 = arith.constant 0.176776692 : f32
    %89 = vector.broadcast %cst_25 : f32 to vector<8x8xf32>
    %90 = arith.mulf %88, %89 : vector<8x8xf32>
    %91 = vector.broadcast %12 : vector<1x8xf32> to vector<8x8xf32>
    %92 = arith.addf %90, %91 : vector<8x8xf32>
    %cst_26 = arith.constant dense<0xFF800000> : vector<8xf32>
    %93 = vector.multi_reduction <maximumf>, %92, %cst_26 [1] : vector<8x8xf32> to vector<8xf32>
    %94 = vector.shape_cast %93 : vector<8xf32> to vector<8x1xf32>
    %95 = vector.broadcast %94 : vector<8x1xf32> to vector<8x8xf32>
    %96 = arith.subf %92, %95 : vector<8x8xf32>
    %97 = math.exp %96 : vector<8x8xf32>
    %cst_27 = arith.constant dense<0.000000e+00> : vector<8xf32>
    %98 = vector.multi_reduction <add>, %97, %cst_27 [1] : vector<8x8xf32> to vector<8xf32>
    %99 = vector.shape_cast %98 : vector<8xf32> to vector<8x1xf32>
    %100 = tpu.reciprocal %99 {approx = true} : vector<8x1xf32> -> vector<8x1xf32>
    %101 = vector.broadcast %100 : vector<8x1xf32> to vector<8x8xf32>
    %102 = arith.mulf %97, %101 : vector<8x8xf32>
    %103 = arith.truncf %102 : vector<8x8xf32> to vector<8x8xbf16>
    %cst_28 = arith.constant dense<0.000000e+00> : vector<8x32xf32>
    %104 = tpu.matmul %103, %87, %cst_28 {dimension_numbers = #tpu.dot_dimension_numbers<[1], [0], [0], [1], [0, 0, 1, 1], [], []>} : vector<8x8xbf16>, vector<8x32xbf16>, vector<8x32xf32> -> vector<8x32xf32>
    %105 = tpu.concatenate %35, %58, %81, %104 in 1 : vector<8x32xf32>, vector<8x32xf32>, vector<8x32xf32>, vector<8x32xf32> -> vector<8x128xf32>
    %106 = arith.truncf %105 : vector<8x128xf32> to vector<8x128xbf16>
    %c0_29 = arith.constant 0 : index
    %c0_30 = arith.constant 0 : index
    %107 = vector.load %arg5[%c0_29, %c0_30] : memref<128x128xbf16, #tpu.memory_space<vmem>>, vector<128x128xbf16>
    %cst_31 = arith.constant dense<0.000000e+00> : vector<8x128xf32>
    %108 = tpu.matmul %106, %107, %cst_31 {dimension_numbers = #tpu.dot_dimension_numbers<[1], [0], [0], [1], [0, 0, 1, 1], [], []>} : vector<8x128xbf16>, vector<128x128xbf16>, vector<8x128xf32> -> vector<8x128xf32>
    %c0_32 = arith.constant 0 : index
    %c0_33 = arith.constant 0 : index
    %109 = vector.load %arg6[%c0_32, %c0_33] : memref<1x128xf32, #tpu.memory_space<vmem>>, vector<1x128xf32>
    %110 = vector.broadcast %109 : vector<1x128xf32> to vector<8x128xf32>
    %111 = arith.addf %108, %110 : vector<8x128xf32>
    %112 = arith.addf %111, %1 : vector<8x128xf32>
    %c0_34 = arith.constant 0 : index
    %c0_35 = arith.constant 0 : index
    %113 = vector.load %arg7[%c0_34, %c0_35] : memref<1x128xf32, #tpu.memory_space<vmem>>, vector<1x128xf32>
    %c0_36 = arith.constant 0 : index
    %c0_37 = arith.constant 0 : index
    %114 = vector.load %arg8[%c0_36, %c0_37] : memref<1x128xf32, #tpu.memory_space<vmem>>, vector<1x128xf32>
    %cst_38 = arith.constant dense<0.000000e+00> : vector<8xf32>
    %115 = vector.multi_reduction <add>, %112, %cst_38 [1] : vector<8x128xf32> to vector<8xf32>
    %116 = vector.shape_cast %115 : vector<8xf32> to vector<8x1xf32>
    %cst_39 = arith.constant 1.280000e+02 : f32
    %117 = vector.broadcast %cst_39 : f32 to vector<8x1xf32>
    %118 = arith.divf %116, %117 : vector<8x1xf32>
    %119 = vector.broadcast %118 : vector<8x1xf32> to vector<8x128xf32>
    %120 = arith.subf %112, %119 : vector<8x128xf32>
    %121 = arith.mulf %120, %120 : vector<8x128xf32>
    %cst_40 = arith.constant dense<0.000000e+00> : vector<8xf32>
    %122 = vector.multi_reduction <add>, %121, %cst_40 [1] : vector<8x128xf32> to vector<8xf32>
    %123 = vector.shape_cast %122 : vector<8xf32> to vector<8x1xf32>
    %cst_41 = arith.constant 1.280000e+02 : f32
    %124 = vector.broadcast %cst_41 : f32 to vector<8x1xf32>
    %125 = arith.divf %123, %124 : vector<8x1xf32>
    %126 = vector.broadcast %118 : vector<8x1xf32> to vector<8x128xf32>
    %127 = arith.subf %112, %126 : vector<8x128xf32>
    %cst_42 = arith.constant 9.99999996E-13 : f32
    %128 = vector.broadcast %cst_42 : f32 to vector<8x1xf32>
    %129 = arith.addf %125, %128 : vector<8x1xf32>
    %130 = math.rsqrt %129 : vector<8x1xf32>
    %131 = vector.broadcast %130 : vector<8x1xf32> to vector<8x128xf32>
    %132 = arith.mulf %127, %131 : vector<8x128xf32>
    %133 = vector.broadcast %113 : vector<1x128xf32> to vector<8x128xf32>
    %134 = arith.mulf %132, %133 : vector<8x128xf32>
    %135 = vector.broadcast %114 : vector<1x128xf32> to vector<8x128xf32>
    %136 = arith.addf %134, %135 : vector<8x128xf32>
    %137 = arith.truncf %136 : vector<8x128xf32> to vector<8x128xbf16>
    %c0_43 = arith.constant 0 : index
    %c0_44 = arith.constant 0 : index
    %138 = vector.load %arg9[%c0_43, %c0_44] : memref<128x256xbf16, #tpu.memory_space<vmem>>, vector<128x256xbf16>
    %cst_45 = arith.constant dense<0.000000e+00> : vector<8x256xf32>
    %139 = tpu.matmul %137, %138, %cst_45 {dimension_numbers = #tpu.dot_dimension_numbers<[1], [0], [0], [1], [0, 0, 1, 1], [], []>} : vector<8x128xbf16>, vector<128x256xbf16>, vector<8x256xf32> -> vector<8x256xf32>
    %c0_46 = arith.constant 0 : index
    %c0_47 = arith.constant 0 : index
    %140 = vector.load %arg10[%c0_46, %c0_47] : memref<1x256xf32, #tpu.memory_space<vmem>>, vector<1x256xf32>
    %141 = vector.broadcast %140 : vector<1x256xf32> to vector<8x256xf32>
    %142 = arith.addf %139, %141 : vector<8x256xf32>
    %cst_48 = arith.constant 5.000000e-01 : f32
    %143 = vector.broadcast %cst_48 : f32 to vector<8x256xf32>
    %144 = arith.mulf %143, %142 : vector<8x256xf32>
    %cst_49 = arith.constant 4.471500e-02 : f32
    %145 = vector.broadcast %cst_49 : f32 to vector<8x256xf32>
    %146 = arith.mulf %145, %142 : vector<8x256xf32>
    %147 = arith.mulf %146, %142 : vector<8x256xf32>
    %148 = arith.mulf %147, %142 : vector<8x256xf32>
    %149 = arith.addf %142, %148 : vector<8x256xf32>
    %cst_50 = arith.constant 0.797884583 : f32
    %150 = vector.broadcast %cst_50 : f32 to vector<8x256xf32>
    %151 = arith.mulf %150, %149 : vector<8x256xf32>
    %152 = math.tanh %151 : vector<8x256xf32>
    %cst_51 = arith.constant 1.000000e+00 : f32
    %153 = vector.broadcast %cst_51 : f32 to vector<8x256xf32>
    %154 = arith.addf %153, %152 : vector<8x256xf32>
    %155 = arith.mulf %144, %154 : vector<8x256xf32>
    %156 = arith.truncf %155 : vector<8x256xf32> to vector<8x256xbf16>
    %c0_52 = arith.constant 0 : index
    %c0_53 = arith.constant 0 : index
    %157 = vector.load %arg11[%c0_52, %c0_53] : memref<256x128xbf16, #tpu.memory_space<vmem>>, vector<256x128xbf16>
    %cst_54 = arith.constant dense<0.000000e+00> : vector<8x128xf32>
    %158 = tpu.matmul %156, %157, %cst_54 {dimension_numbers = #tpu.dot_dimension_numbers<[1], [0], [0], [1], [0, 0, 1, 1], [], []>} : vector<8x256xbf16>, vector<256x128xbf16>, vector<8x128xf32> -> vector<8x128xf32>
    %c0_55 = arith.constant 0 : index
    %c0_56 = arith.constant 0 : index
    %159 = vector.load %arg12[%c0_55, %c0_56] : memref<1x128xf32, #tpu.memory_space<vmem>>, vector<1x128xf32>
    %160 = vector.broadcast %159 : vector<1x128xf32> to vector<8x128xf32>
    %161 = arith.addf %158, %160 : vector<8x128xf32>
    %162 = arith.addf %161, %136 : vector<8x128xf32>
    %c0_57 = arith.constant 0 : index
    %c0_58 = arith.constant 0 : index
    %163 = vector.load %arg13[%c0_57, %c0_58] : memref<1x128xf32, #tpu.memory_space<vmem>>, vector<1x128xf32>
    %c0_59 = arith.constant 0 : index
    %c0_60 = arith.constant 0 : index
    %164 = vector.load %arg14[%c0_59, %c0_60] : memref<1x128xf32, #tpu.memory_space<vmem>>, vector<1x128xf32>
    %cst_61 = arith.constant dense<0.000000e+00> : vector<8xf32>
    %165 = vector.multi_reduction <add>, %162, %cst_61 [1] : vector<8x128xf32> to vector<8xf32>
    %166 = vector.shape_cast %165 : vector<8xf32> to vector<8x1xf32>
    %cst_62 = arith.constant 1.280000e+02 : f32
    %167 = vector.broadcast %cst_62 : f32 to vector<8x1xf32>
    %168 = arith.divf %166, %167 : vector<8x1xf32>
    %169 = vector.broadcast %168 : vector<8x1xf32> to vector<8x128xf32>
    %170 = arith.subf %162, %169 : vector<8x128xf32>
    %171 = arith.mulf %170, %170 : vector<8x128xf32>
    %cst_63 = arith.constant dense<0.000000e+00> : vector<8xf32>
    %172 = vector.multi_reduction <add>, %171, %cst_63 [1] : vector<8x128xf32> to vector<8xf32>
    %173 = vector.shape_cast %172 : vector<8xf32> to vector<8x1xf32>
    %cst_64 = arith.constant 1.280000e+02 : f32
    %174 = vector.broadcast %cst_64 : f32 to vector<8x1xf32>
    %175 = arith.divf %173, %174 : vector<8x1xf32>
    %176 = vector.broadcast %168 : vector<8x1xf32> to vector<8x128xf32>
    %177 = arith.subf %162, %176 : vector<8x128xf32>
    %cst_65 = arith.constant 9.99999996E-13 : f32
    %178 = vector.broadcast %cst_65 : f32 to vector<8x1xf32>
    %179 = arith.addf %175, %178 : vector<8x1xf32>
    %180 = math.rsqrt %179 : vector<8x1xf32>
    %181 = vector.broadcast %180 : vector<8x1xf32> to vector<8x128xf32>
    %182 = arith.mulf %177, %181 : vector<8x128xf32>
    %183 = vector.broadcast %163 : vector<1x128xf32> to vector<8x128xf32>
    %184 = arith.mulf %182, %183 : vector<8x128xf32>
    %185 = vector.broadcast %164 : vector<1x128xf32> to vector<8x128xf32>
    %186 = arith.addf %184, %185 : vector<8x128xf32>
    %c0_66 = arith.constant 0 : index
    %c0_67 = arith.constant 0 : index
    %c0_68 = arith.constant 0 : index
    %187 = vector.load %arg15[%c0_66, %c0_67, %c0_68] : memref<1x8x128xf32, #tpu.memory_space<vmem>>, vector<1x8x128xf32>
    %188 = vector.shape_cast %187 : vector<1x8x128xf32> to vector<8x128xf32>
    %189 = vector.shape_cast %186 : vector<8x128xf32> to vector<1x8x128xf32>
    tpu.vector_store %arg15[%c0_66, %c0_67, %c0_68], %189 {strides = array<i32>} : memref<1x8x128xf32, #tpu.memory_space<vmem>>, vector<1x8x128xf32>,
    return
  }
  func.func @transform_0(%arg0: i32) -> (i32, i32, i32) {
    %c0_i32 = arith.constant 0 : i32
    %c0_i32_0 = arith.constant 0 : i32
    %c0_i32_1 = arith.constant 0 : i32
    return %arg0, %c0_i32, %c0_i32_0 : i32, i32, i32
  }
  func.func @transform_1(%arg0: i32) -> (i32, i32, i32) {
    %c0_i32 = arith.constant 0 : i32
    %c0_i32_0 = arith.constant 0 : i32
    %c0_i32_1 = arith.constant 0 : i32
    return %arg0, %c0_i32, %c0_i32_0 : i32, i32, i32
  }
  func.func @transform_2(%arg0: i32) -> (i32, i32) {
    %c0_i32 = arith.constant 0 : i32
    %c0_i32_0 = arith.constant 0 : i32
    %c0_i32_1 = arith.constant 0 : i32
    return %c0_i32, %c0_i32_0 : i32, i32
  }
  func.func @transform_3(%arg0: i32) -> (i32, i32) {
    %c0_i32 = arith.constant 0 : i32
    %c0_i32_0 = arith.constant 0 : i32
    %c0_i32_1 = arith.constant 0 : i32
    return %c0_i32, %c0_i32_0 : i32, i32
  }
  func.func @transform_4(%arg0: i32) -> (i32, i32) {
    %c0_i32 = arith.constant 0 : i32
    %c0_i32_0 = arith.constant 0 : i32
    %c0_i32_1 = arith.constant 0 : i32
    return %c0_i32, %c0_i32_0 : i32, i32
  }
  func.func @transform_5(%arg0: i32) -> (i32, i32) {
    %c0_i32 = arith.constant 0 : i32
    %c0_i32_0 = arith.constant 0 : i32
    %c0_i32_1 = arith.constant 0 : i32
    return %c0_i32, %c0_i32_0 : i32, i32
  }
  func.func @transform_6(%arg0: i32) -> (i32, i32) {
    %c0_i32 = arith.constant 0 : i32
    %c0_i32_0 = arith.constant 0 : i32
    %c0_i32_1 = arith.constant 0 : i32
    return %c0_i32, %c0_i32_0 : i32, i32
  }
  func.func @transform_7(%arg0: i32) -> (i32, i32) {
    %c0_i32 = arith.constant 0 : i32
    %c0_i32_0 = arith.constant 0 : i32
    %c0_i32_1 = arith.constant 0 : i32
    return %c0_i32, %c0_i32_0 : i32, i32
  }
  func.func @transform_8(%arg0: i32) -> (i32, i32) {
    %c0_i32 = arith.constant 0 : i32
    %c0_i32_0 = arith.constant 0 : i32
    %c0_i32_1 = arith.constant 0 : i32
    return %c0_i32, %c0_i32_0 : i32, i32
  }
  func.func @transform_9(%arg0: i32) -> (i32, i32) {
    %c0_i32 = arith.constant 0 : i32
    %c0_i32_0 = arith.constant 0 : i32
    %c0_i32_1 = arith.constant 0 : i32
    return %c0_i32, %c0_i32_0 : i32, i32
  }
  func.func @transform_10(%arg0: i32) -> (i32, i32) {
    %c0_i32 = arith.constant 0 : i32
    %c0_i32_0 = arith.constant 0 : i32
    %c0_i32_1 = arith.constant 0 : i32
    return %c0_i32, %c0_i32_0 : i32, i32
  }
  func.func @transform_11(%arg0: i32) -> (i32, i32) {
    %c0_i32 = arith.constant 0 : i32
    %c0_i32_0 = arith.constant 0 : i32
    %c0_i32_1 = arith.constant 0 : i32
    return %c0_i32, %c0_i32_0 : i32, i32
  }
  func.func @transform_12(%arg0: i32) -> (i32, i32) {
    %c0_i32 = arith.constant 0 : i32
    %c0_i32_0 = arith.constant 0 : i32
    %c0_i32_1 = arith.constant 0 : i32
    return %c0_i32, %c0_i32_0 : i32, i32
  }
  func.func @transform_13(%arg0: i32) -> (i32, i32) {
    %c0_i32 = arith.constant 0 : i32
    %c0_i32_0 = arith.constant 0 : i32
    %c0_i32_1 = arith.constant 0 : i32
    return %c0_i32, %c0_i32_0 : i32, i32
  }
  func.func @transform_14(%arg0: i32) -> (i32, i32, i32) {
    %c0_i32 = arith.constant 0 : i32
    %c0_i32_0 = arith.constant 0 : i32
    %c0_i32_1 = arith.constant 0 : i32
    return %arg0, %c0_i32, %c0_i32_0 : i32, i32, i32
  }
}

module attributes {stable_mosaic.version = 11 : i64} {
  func.func @_layernorm_kernel(%arg0: i32, %arg1: memref<16x128xf32, #tpu.memory_space<vmem>>, %arg2: memref<1x128xf32, #tpu.memory_space<vmem>>, %arg3: memref<1x128xf32, #tpu.memory_space<vmem>>, %arg4: memref<16x128xf32, #tpu.memory_space<vmem>>) attributes {dimension_semantics = [#tpu.dimension_semantics<arbitrary>], iteration_bounds = array<i64: 1>, scalar_prefetch = 0 : i64, scratch_operands = 0 : i64, tpu.core_type = #tpu.core_type<tc>, window_params = [{pipeline_mode = #tpu.pipeline_mode<synchronous>, transform_indices = @transform_0, window_bounds = array<i64: 16, 128>}, {pipeline_mode = #tpu.pipeline_mode<synchronous>, transform_indices = @transform_1, window_bounds = array<i64: 1, 128>}, {pipeline_mode = #tpu.pipeline_mode<synchronous>, transform_indices = @transform_2, window_bounds = array<i64: 1, 128>}, {pipeline_mode = #tpu.pipeline_mode<synchronous>, transform_indices = @transform_3, window_bounds = array<i64: 16, 128>}]} {
    %c0 = arith.constant 0 : index
    %c0_0 = arith.constant 0 : index
    %0 = vector.load %arg1[%c0, %c0_0] : memref<16x128xf32, #tpu.memory_space<vmem>>, vector<16x128xf32>
    %c0_1 = arith.constant 0 : index
    %c0_2 = arith.constant 0 : index
    %1 = vector.load %arg2[%c0_1, %c0_2] : memref<1x128xf32, #tpu.memory_space<vmem>>, vector<1x128xf32>
    %c0_3 = arith.constant 0 : index
    %c0_4 = arith.constant 0 : index
    %2 = vector.load %arg3[%c0_3, %c0_4] : memref<1x128xf32, #tpu.memory_space<vmem>>, vector<1x128xf32>
    %cst = arith.constant dense<0.000000e+00> : vector<16xf32>
    %3 = vector.multi_reduction <add>, %0, %cst [1] : vector<16x128xf32> to vector<16xf32>
    %4 = vector.shape_cast %3 : vector<16xf32> to vector<16x1xf32>
    %cst_5 = arith.constant 1.280000e+02 : f32
    %5 = vector.broadcast %cst_5 : f32 to vector<16x1xf32>
    %6 = arith.divf %4, %5 : vector<16x1xf32>
    %7 = vector.broadcast %6 : vector<16x1xf32> to vector<16x128xf32>
    %8 = arith.subf %0, %7 : vector<16x128xf32>
    %9 = arith.mulf %8, %8 : vector<16x128xf32>
    %cst_6 = arith.constant dense<0.000000e+00> : vector<16xf32>
    %10 = vector.multi_reduction <add>, %9, %cst_6 [1] : vector<16x128xf32> to vector<16xf32>
    %11 = vector.shape_cast %10 : vector<16xf32> to vector<16x1xf32>
    %cst_7 = arith.constant 1.280000e+02 : f32
    %12 = vector.broadcast %cst_7 : f32 to vector<16x1xf32>
    %13 = arith.divf %11, %12 : vector<16x1xf32>
    %14 = vector.broadcast %6 : vector<16x1xf32> to vector<16x128xf32>
    %15 = arith.subf %0, %14 : vector<16x128xf32>
    %cst_8 = arith.constant 9.99999996E-13 : f32
    %16 = vector.broadcast %cst_8 : f32 to vector<16x1xf32>
    %17 = arith.addf %13, %16 : vector<16x1xf32>
    %18 = math.rsqrt %17 : vector<16x1xf32>
    %19 = vector.broadcast %18 : vector<16x1xf32> to vector<16x128xf32>
    %20 = arith.mulf %15, %19 : vector<16x128xf32>
    %21 = vector.broadcast %1 : vector<1x128xf32> to vector<16x128xf32>
    %22 = arith.mulf %20, %21 : vector<16x128xf32>
    %23 = vector.broadcast %2 : vector<1x128xf32> to vector<16x128xf32>
    %24 = arith.addf %22, %23 : vector<16x128xf32>
    %c0_9 = arith.constant 0 : index
    %c0_10 = arith.constant 0 : index
    %25 = vector.load %arg4[%c0_9, %c0_10] : memref<16x128xf32, #tpu.memory_space<vmem>>, vector<16x128xf32>
    tpu.vector_store %arg4[%c0_9, %c0_10], %24 {strides = array<i32>} : memref<16x128xf32, #tpu.memory_space<vmem>>, vector<16x128xf32>,
    return
  }
  func.func @transform_0(%arg0: i32) -> (i32, i32) {
    %c0_i32 = arith.constant 0 : i32
    %c0_i32_0 = arith.constant 0 : i32
    %c0_i32_1 = arith.constant 0 : i32
    return %c0_i32, %c0_i32_0 : i32, i32
  }
  func.func @transform_1(%arg0: i32) -> (i32, i32) {
    %c0_i32 = arith.constant 0 : i32
    %c0_i32_0 = arith.constant 0 : i32
    %c0_i32_1 = arith.constant 0 : i32
    return %c0_i32, %c0_i32_0 : i32, i32
  }
  func.func @transform_2(%arg0: i32) -> (i32, i32) {
    %c0_i32 = arith.constant 0 : i32
    %c0_i32_0 = arith.constant 0 : i32
    %c0_i32_1 = arith.constant 0 : i32
    return %c0_i32, %c0_i32_0 : i32, i32
  }
  func.func @transform_3(%arg0: i32) -> (i32, i32) {
    %c0_i32 = arith.constant 0 : i32
    %c0_i32_0 = arith.constant 0 : i32
    %c0_i32_1 = arith.constant 0 : i32
    return %c0_i32, %c0_i32_0 : i32, i32
  }
}

</mosaic_0001>

<bundles_post_ra>
// kernel: mbert_forward.4
= control target key start
LH: loop header
LB: loop body
LE: loop exit
PB: predicated region body
PF: predicated region fallthrough
CT: control target
= control target key end

     0   :  { %v90_v2 = vmov 128.0   ;;  %s129_s0 = inlined_call_operand.vmem [shape: f32[16,128], index: 0, kind: input, shape index: {}]   ;;  %s130_s1 = inlined_call_operand.vmem [shape: f32[1,128], index: 1, kind: input, shape index: {}]   ;;  %s131_s2 = inlined_call_operand.vmem [shape: f32[1,128], index: 2, kind: input, shape index: {}]   ;;  %s132_s3 = inlined_call_operand.vmem [shape: f32[16,128], index: 3, kind: output, shape index: {}]  }
   0x1   :  { %v14_v0 = vld [vmem:[%s129_s0] sm:$0xff]  ;;  %v15_v1 = vld [vmem:[%s129_s0 + $0x8] sm:$0xff]  ;;  %84 = vrcp.f32 %v90_v2 }
   0x2   :  { %18 = vadd.xlane.f32.xlu0 %v14_v0  ;;  %v82_v31 = vld [vmem:[%s130_s1] ss:$0 sm:$0xff] }
   0x3   :  { %v83_v34 = vld [vmem:[%s131_s2] ss:$0 sm:$0xff] }
   0x7   :  { %v85_v3 = vpop.eup %84 }
   0x8   :  { %v23_v4 = vmul.f32 128.0, %v85_v3  ;;  %vm27_vm0 = vweird.f32 %v85_v3 }
   0xa   :  { %20 = vadd.xlane.f32.xlu0 %v15_v1  ;;  %v24_v5 = vsub.f32 1.0, %v23_v4 }
   0xc   :  { %v25_v6 = vmul.f32 %v85_v3, %v24_v5 }
   0xe   :  { %v26_v7 = vadd.f32 %v85_v3, %v25_v6 }
  0x10   :  { %v28_v8 = vsel %vm27_vm0, %v85_v3, %v26_v7 }
  0x75   :  { %v19_v9 = vpop.xlane.xlu0 %18 }
  0x76   :  { %v29_v10 = vmul.f32 %v28_v8, %v19_v9 }
  0x78   :  { %v31_v11 = vsub.f32 %v14_v0, %v29_v10 }
  0x7a   :  { %v33_v12 = vmul.f32 %v31_v11, %v31_v11 }
  0x7c   :  { %35 = vadd.xlane.f32.xlu1 %v33_v12 }
  0x7d   :  { %v21_v13 = vpop.xlane.xlu0 %20 }
  0x7e   :  { %v30_v14 = vmul.f32 %v28_v8, %v21_v13 }
  0x80   :  { %v32_v15 = vsub.f32 %v15_v1, %v30_v14 }
  0x82   :  { %v34_v16 = vmul.f32 %v32_v15, %v32_v15 }
  0x84   :  { %37 = vadd.xlane.f32.xlu1 %v34_v16 }
  0xef   :  { %v36_v17 = vpop.xlane.xlu1 %35 }
  0xf0   :  { %v39_v18 = vmul.f32 %v36_v17, %v28_v8 }
  0xf2   :  { %v41_v19 = vadd.f32 1e-12, %v39_v18 }
  0xf4   :  { %86 = vrsqrt.f32 %v41_v19  ;;  %vm49_vm2 = vweird.f32 %v41_v19 }
  0xf7   :  { %v38_v20 = vpop.xlane.xlu1 %37 }
  0xf8   :  { %v40_v21 = vmul.f32 %v38_v20, %v28_v8 }
  0xfa   :  { %v87_v22 = vpop.eup %86  ;;  %v42_v23 = vadd.f32 1e-12, %v40_v21 }
  0xfb   :  { %v44_v24 = vmul.f32 %v87_v22, %v41_v19  ;;  %vm50_vm1 = vweird.f32 %v87_v22 }
  0xfc   :  { %88 = vrsqrt.f32 %v42_v23  ;;  %vm51_vm3 = vmor %vm49_vm2, %vm50_vm1  ;;  %vm59_vm5 = vweird.f32 %v42_v23 }
  0xfd   :  { %v45_v25 = vmul.f32 %v87_v22, %v44_v24 }
  0xff   :  { %v46_v26 = vmul.f32 0.5, %v45_v25 }
 0x101   :  { %v47_v27 = vsub.f32 1.5, %v46_v26 }
 0x102   :  { %v89_v28 = vpop.eup %88 }
 0x103   :  { %v48_v29 = vmul.f32 %v87_v22, %v47_v27  ;;  %v54_v30 = vmul.f32 %v89_v28, %v42_v23  ;;  %vm60_vm4 = vweird.f32 %v89_v28 }
 0x104   :  { %vm61_vm6 = vmor %vm59_vm5, %vm60_vm4 }
 0x105   :  { %v52_v32 = vsel %vm51_vm3, %v87_v22, %v48_v29  ;;  %v55_v33 = vmul.f32 %v89_v28, %v54_v30 }
 0x106   :  { %v63_v35 = vmul.f32 %v52_v32, %v31_v11 }
 0x107   :  { %v56_v36 = vmul.f32 0.5, %v55_v33 }
 0x108   :  { %v68_v37 = vmul.f32 %v82_v31, %v63_v35 }
 0x109   :  { %v57_v38 = vsub.f32 1.5, %v56_v36 }
 0x10a   :  { %v73_v39 = vadd.f32 %v83_v34, %v68_v37 }
 0x10b   :  { %v58_v40 = vmul.f32 %v89_v28, %v57_v38 }
 0x10c   :  { %75 = vst [vmem:[%s132_s3] sm:$0xff] %v73_v39 }
 0x10d   :  { %v62_v41 = vsel %vm61_vm6, %v89_v28, %v58_v40 }
 0x10e   :  { %v64_v42 = vmul.f32 %v62_v41, %v32_v15 }
 0x110   :  { %v69_v43 = vmul.f32 %v82_v31, %v64_v42 }
 0x112   :  { %v74_v44 = vadd.f32 %v83_v34, %v69_v43 }
 0x114   :  { %76 = vst [vmem:[%s132_s3 + $0x8] sm:$0xff] %v74_v44 }

// kernel: mbert_forward.7
= control target key start
LH: loop header
LB: loop body
LE: loop exit
PB: predicated region body
PF: predicated region fallthrough
CT: control target
= control target key end

     0   :  { %s407_s0 = inlined_call_operand.vmem [shape: f32[2,128], index: 0, kind: input, shape index: {}]   ;;  %s408_s1 = inlined_call_operand.vmem [shape: bf16[128,128], index: 1, kind: input, shape index: {}]   ;;  %s409_s2 = inlined_call_operand.vmem [shape: f32[1,128], index: 2, kind: input, shape index: {}]   ;;  %s410_s3 = inlined_call_operand.vmem [shape: bf16[128,8], index: 3, kind: input, shape index: {}]   ;;  %s411_s4 = inlined_call_operand.vmem [shape: f32[1,8], index: 4, kind: input, shape index: {}]   ;;  %s412_s5 = inlined_call_operand.hbm [shape: f32[2,8], index: 5, kind: output, shape index: {}]  }
   0x1   :  { %v276_v0 = vld [vmem:[%s408_s1 + $0x38] sm:$0xff]  ;;  %v275_v1 = vld [vmem:[%s408_s1 + $0x30] sm:$0xff] }
   0x2   :  { %91 = vmatpush.bf16.msra.mxu0 %v276_v0  ;;  %v284_v2 = vld [vmem:[%s410_s3 + $0x38] sm:$0xff]  ;;  %v283_v3 = vld [vmem:[%s410_s3 + $0x30] sm:$0xff] }
   0x3   :  { %174 = vmatpush.bf16.msra.mxu1 %v284_v2 }
   0x4   :  { %10 = vsyncpa [#allocation3], 0  ;;  %v274_v4 = vld [vmem:[%s408_s1 + $0x28] sm:$0xff]  ;;  %v273_v6 = vld [vmem:[%s408_s1 + $0x20] sm:$0xff]  ;;  %s316_s29 = smov [#allocation2]   ;;  %s196_s7 = sshll.u32 %s412_s5, 4  ;;  %s197_s7 = int_to_ptr.hbm [resolvable:$true] %s196_s7 }
   0x5   :  { %v282_v5 = vld [vmem:[%s410_s3 + $0x28] sm:$0xff]  ;;  %v281_v7 = vld [vmem:[%s410_s3 + $0x20] sm:$0xff]  ;;  %v272_v8 = vld [vmem:[%s408_s1 + $0x18] sm:$0xff]  ;;  %s194_s30 = sshll.u32 %s316_s29, 4  ;;  %vm187_vm0 = vcmask 58368   ;;  %s195_s30 = int_to_ptr.vmem [resolvable:$true] %s194_s30 }
   0x6   :  { %92 = vmatpush.bf16.msra.mxu0 %v275_v1  ;;  %v280_v9 = vld [vmem:[%s410_s3 + $0x18] sm:$0xff]  ;;  %v271_v10 = vld [vmem:[%s408_s1 + $0x10] sm:$0xff]  ;;  %v270_v11 = vld [vmem:[%s408_s1 + $0x8] sm:$0xff] }
   0x7   :  { %175 = vmatpush.bf16.msra.mxu1 %v283_v3  ;;  %v269_v12 = vld [vmem:[%s408_s1] sm:$0xff]  ;;  %v279_v15 = vld [vmem:[%s410_s3 + $0x10] sm:$0xff]  ;;  %v278_v16 = vld [vmem:[%s410_s3 + $0x8] sm:$0xff] }
   0x8   :  { %v21_v13 = vld [vmem:[%s407_s0] sm:$0x3] }
   0x9   :  { %v22_v14 = vpack.c.bf16 %v21_v13, %v21_v13  ;;  %v277_v17 = vld [vmem:[%s410_s3] sm:$0xff] }
   0xa   :  { %93 = vmatpush.bf16.msra.mxu0 %v274_v4  ;;  %v286_v18 = vld [vmem:[%s409_s2] ss:$0 sm:$0xff] }
   0xb   :  { %176 = vmatpush.bf16.msra.mxu1 %v282_v5  ;;  %v287_v24 = vld [vmem:[%s411_s4] ss:$0 sm:$0xff] }
   0xe   :  { %94 = vmatpush.bf16.msra.mxu0 %v273_v6 }
   0xf   :  { %177 = vmatpush.bf16.msra.mxu1 %v281_v7 }
  0x12   :  { %95 = vmatpush.bf16.msra.mxu0 %v272_v8 }
  0x13   :  { %178 = vmatpush.bf16.msra.mxu1 %v280_v9 }
  0x16   :  { %96 = vmatpush.bf16.msra.mxu0 %v271_v10 }
  0x17   :  { %179 = vmatpush.bf16.msra.mxu1 %v279_v15 }
  0x1a   :  { %97 = vmatpush.bf16.msra.mxu0 %v270_v11 }
  0x1b   :  { %180 = vmatpush.bf16.msra.mxu1 %v278_v16 }
  0x1e   :  { %98 = vmatpush.bf16.msra.mxu0 %v269_v12 }
  0x1f   :  { %181 = vmatpush.bf16.msra.mxu1 %v277_v17 }
  0x21   :  { %99 = vmatmul.bf16.vlgmr.msra.gmra.mxu0 %v22_v14 }
  0x9e   :  { %v100_v19 = vpop.f32.mrf.mxu0 }
  0x9f   :  { %v101_v20 = vadd.f32 %v286_v18, %v100_v19 }
  0xa1   :  { %288 = vtanh.f32 %v101_v20 }
  0xa6   :  { %v102_v21 = vpop.f32.mrf.mxu0 }
  0xa7   :  { %v289_v22 = vpop.eup %288 }
  0xa8   :  { %v105_v23 = vpack.c.bf16 %v289_v22, %v289_v22 }
  0xaa   :  { %182 = vmatmul.bf16.vlgmr.msra.gmra.mxu1 %v105_v23 }
 0x127   :  { %v183_v25 = vpop.f32.mrf.mxu1 }
 0x128   :  { %v184_v26 = vadd.f32 %v287_v24, %v183_v25 }
 0x12a   :  { %188 = vst.msk [vmem:[#allocation2] sm:$0x3] %vm187_vm0, %v184_v26 }
 0x12b   :  { %199 = dma.vmem_to_hbm [thread:$0]  %s195_s30, 32, %s197_s7, [#allocation3]  }
 0x12f   :  { %v185_v27 = vpop.f32.mrf.mxu1 }
 0x130   :  { %314 = dma.done.wait [#allocation3], 32  }
 0x131   :  { %315 = vsyncadd [#allocation3], 4294967264 }
 0x132   :  { %204 = vsyncpa [#allocation3], 1 }

// kernel: mbert_forward.5
= control target key start
LH: loop header
LB: loop body
LE: loop exit
PB: predicated region body
PF: predicated region fallthrough
CT: control target
= control target key end

     0   :  { %s2467_s0 = inlined_call_operand.vmem [shape: f32[2,8,128], index: 0, kind: input, shape index: {}]   ;;  %s2468_s1 = inlined_call_operand.vmem [shape: f32[2,1,8], index: 1, kind: input, shape index: {}]   ;;  %s2469_s2 = inlined_call_operand.vmem [shape: bf16[128,384], index: 2, kind: input, shape index: {}]   ;;  %s2470_s3 = inlined_call_operand.vmem [shape: f32[1,384], index: 3, kind: input, shape index: {}]   ;;  %s2471_s4 = inlined_call_operand.hbm [shape: bf16[128,128], index: 4, kind: input, shape index: {}]   ;;  %s2472_s5 = inlined_call_operand.vmem [shape: f32[1,128], index: 5, kind: input, shape index: {}]   ;;  %s2473_s6 = inlined_call_operand.vmem [shape: f32[1,128], index: 6, kind: input, shape index: {}]   ;;  %s2474_s7 = inlined_call_operand.vmem [shape: f32[1,128], index: 7, kind: input, shape index: {}]   ;;  %s2475_s8 = inlined_call_operand.hbm [shape: bf16[128,256], index: 8, kind: input, shape index: {}]   ;;  %s2476_s9 = inlined_call_operand.vmem [shape: f32[1,256], index: 9, kind: input, shape index: {}]   ;;  %s2477_s10 = inlined_call_operand.hbm [shape: bf16[256,128], index: 10, kind: input, shape index: {}]   ;;  %s2478_s11 = inlined_call_operand.vmem [shape: f32[1,128], index: 11, kind: input, shape index: {}]   ;;  %s2479_s12 = inlined_call_operand.vmem [shape: f32[1,128], index: 12, kind: input, shape index: {}]   ;;  %s2480_s13 = inlined_call_operand.vmem [shape: f32[1,128], index: 13, kind: input, shape index: {}]   ;;  %s2481_s14 = inlined_call_operand.vmem [shape: f32[2,8,128], index: 14, kind: output, shape index: {}]  }
   0x1   :  { %2482 = sst [smem:[#allocation9_spill]] %s2471_s4 }
   0x2   :  { %2483 = sst [smem:[#allocation10_spill]] %s2475_s8 }
   0x3   :  { %19 = vsyncpa [#allocation3], 0 }
   0x4   :  { %20 = vsyncpa [#allocation5], 0  ;;  %s2160_s29 = smov 0  }
   0x5 LB: > { %s2484_s8 = sld [smem:[#allocation10_spill]]  ;;  %s2169_s17 = sadd.s32 4294967295, %s2072_s29   ;;  %s2072_s29 = sphi %s2160_s29, %s26_s29  }
   0x6   : > { %p1547_p0 = scmp.ge.s32.totalorder %s2072_s29, 1  ;;  %p361_p1 = scmp.lt.s32.totalorder %s2072_s29, 3 }
   0x7   : > { %p1910_p2 = scmp.eq.s32.totalorder %s2169_s17, 0  ;;  %s2074_s19 = smov [#allocation4]  }
   0x8   : > { %p2174_p3 = pnand %p1547_p0, %p361_p1  ;;  %s403_s20 = sshll.u32 %s2074_s19, 4  ;;  %s404_s20 = int_to_ptr.vmem [resolvable:$true] %s403_s20 }
   0x9   : > { %s2486_s4 = sld [smem:[#allocation9_spill]]  ;;  %s2075_s25 = smov [#allocation2]  }
   0xa   : > { %p1900_p4 = pneg %p2174_p3  ;;  %s380_s26 = sshll.u32 %s2075_s25, 4  ;;  %s381_s26 = int_to_ptr.vmem [resolvable:$true] %s380_s26 }
   0xb   : > { %s401_s16 = sshll.u32 %s2484_s8, 4  ;;  %s2076_s27 = smov 128   ;;  %s402_s16 = int_to_ptr.hbm [resolvable:$true] %s401_s16 }
   0xc   : > { %p2185_p5 = pnand %p1910_p2, %p1900_p4  ;;  %s2077_s28 = smov 8  }
   0xd   : > { %s418_s19 = sshll.u32 %s2477_s10, 4  ;;  %s2078_s21 = smov 64   ;;  %s419_s19 = int_to_ptr.hbm [resolvable:$true] %s418_s19 }
   0xe   : > { %1906 = dma.hbm_to_vmem [thread:$0]  (!%p2185_p5), %s402_s16, 2048, %s404_s20, [#allocation5], %s2076_s27, %s2076_s27, %s2077_s28  }
   0xf   : > { %s378_s23 = sshll.u32 %s2486_s4, 4  ;;  %s2079_s22 = smov 4   ;;  %s379_s23 = int_to_ptr.hbm [resolvable:$true] %s378_s23 }
  0x10   : > { %1903 = dma.hbm_to_vmem [thread:$0]  (!%p2185_p5), %s379_s23, 1024, %s381_s26, [#allocation3], %s2078_s21, %s2078_s21, %s2079_s22  }
  0x11   : > { %s2080_s4 = smov [#allocation6]   ;;  %458 = sbr.rel (%p2174_p3) target bundleno = 2230 (0x8b6), region = 76 }
  0x12   : > { %s420_s8 = sshll.u32 %s2080_s4, 4  ;;  %s421_s8 = int_to_ptr.vmem [resolvable:$true] %s420_s8 }
  0x13   : > { %1909 = dma.hbm_to_vmem [thread:$0]  (!%p2185_p5), %s419_s19, 2048, %s421_s8, [#allocation5], %s2078_s21, %s2078_s21, %s2079_s22  }
  0x16   : > { %2063 = dma.done.wait (%p1910_p2), [#allocation3], 1024  }
  0x17   : > { %2065 = vsyncadd (%p1910_p2), [#allocation3], 4294966272 }
  0x18   : > { %2067 = dma.done.wait (%p1910_p2), [#allocation5], 4096  }
  0x19   : > { %2069 = vsyncadd (%p1910_p2), [#allocation5], 4294963200  ;;  %v1644_v0 = vld [vmem:[%s2469_s2 + $0xa8] sm:$0xf]  ;;  %v1846_v1 = vld [vmem:[%s2469_s2 + $0xb0] sm:$0xf0] }
  0x1a   : > { %v1845_v2 = vld [vmem:[%s2469_s2 + $0xac] sm:$0xf]  ;;  %v1645_v3 = vor.u32 %v1846_v1, %v1644_v0  ;;  %v1646_v4 = vld [vmem:[%s2469_s2 + $0xb4] sm:$0xf0]  ;;  %v1632_v5 = vld [vmem:[%s2469_s2 + $0x90] sm:$0xf] }
  0x1b   : > { %v1843_v6 = vld [vmem:[%s2469_s2 + $0x98] sm:$0xf0]  ;;  %v1649_v7 = vor.u32 %v1845_v2, %v1646_v4  ;;  %v1842_v8 = vld [vmem:[%s2469_s2 + $0x94] sm:$0xf]  ;;  %v1634_v9 = vld [vmem:[%s2469_s2 + $0x9c] sm:$0xf0] }
  0x1c   : > { %698 = vmatpush.bf16.msra.mxu0 %v1645_v3  ;;  %v1633_v10 = vor.u32 %v1843_v6, %v1632_v5  ;;  %v1637_v11 = vor.u32 %v1842_v8, %v1634_v9  ;;  %v1620_v12 = vld [vmem:[%s2469_s2 + $0x78] sm:$0xf]  ;;  %v1840_v13 = vld [vmem:[%s2469_s2 + $0x80] sm:$0xf0]  ;;  %v1839_v14 = vld [vmem:[%s2469_s2 + $0x7c] sm:$0xf] }
  0x1d   : > { %711 = vmatpush.bf16.msra.mxu1 %v1649_v7  ;;  %v1622_v15 = vld [vmem:[%s2469_s2 + $0x84] sm:$0xf0]  ;;  %v1621_v16 = vor.u32 %v1840_v13, %v1620_v12  ;;  %v1608_v18 = vld [vmem:[%s2469_s2 + $0x60] sm:$0xf]  ;;  %v1837_v19 = vld [vmem:[%s2469_s2 + $0x68] sm:$0xf0] }
  0x1e   : > { %v1625_v17 = vor.u32 %v1839_v14, %v1622_v15  ;;  %v1836_v20 = vld [vmem:[%s2469_s2 + $0x64] sm:$0xf]  ;;  %v1610_v21 = vld [vmem:[%s2469_s2 + $0x6c] sm:$0xf0]  ;;  %p516_p6 = scmp.lt.s32.totalorder %s2169_s17, 1  ;;  %v1609_v22 = vor.u32 %v1837_v19, %v1608_v18  ;;  %vm741_vm0 = vcmask 261120  }
  0x1f   : > { %v1652_v23 = vld [vmem:[%s2469_s2 + $0xb0] sm:$0xf]  ;;  %v1847_v24 = vld [vmem:[%s2469_s2 + $0xb8] sm:$0xf0]  ;;  %v1640_v25 = vld [vmem:[%s2469_s2 + $0x98] sm:$0xf]  ;;  %v1613_v26 = vor.u32 %v1836_v20, %v1610_v21 }
  0x20   : > { %699 = vmatpush.bf16.msra.mxu0 %v1633_v10  ;;  %v1596_v27 = vld [vmem:[%s2469_s2 + $0x48] sm:$0xf]  ;;  %v1834_v28 = vld [vmem:[%s2469_s2 + $0x50] sm:$0xf0]  ;;  %v1653_v29 = vor.u32 %v1847_v24, %v1652_v23  ;;  %v1844_v30 = vld [vmem:[%s2469_s2 + $0xa0] sm:$0xf0] }
  0x21   : > { %712 = vmatpush.bf16.msra.mxu1 %v1637_v11  ;;  %v1833_v31 = vld [vmem:[%s2469_s2 + $0x4c] sm:$0xf]  ;;  %v1598_v32 = vld [vmem:[%s2469_s2 + $0x54] sm:$0xf0]  ;;  %s2489_s17 = smov (!%p516_p6, %s2169_s17), 1  ;;  %v1641_v33 = vor.u32 %v1844_v30, %v1640_v25  ;;  %v1597_v34 = vor.u32 %v1834_v28, %v1596_v27  ;;  %s2081_s25 = smov 64  }
  0x22   : > { %724 = vmatpush.bf16.msra.mxu2 %v1653_v29  ;;  %v1584_v35 = vld [vmem:[%s2469_s2 + $0x30] sm:$0xf]  ;;  %v1628_v36 = vld [vmem:[%s2469_s2 + $0x80] sm:$0xf]  ;;  %v1841_v37 = vld [vmem:[%s2469_s2 + $0x88] sm:$0xf0]  ;;  %v1601_v38 = vor.u32 %v1833_v31, %v1598_v32  ;;  %s522_s19 = scalar_lea.vmem %s2468_s1, %s2489_s17 }
  0x23   : > { %v1831_v39 = vld [vmem:[%s2469_s2 + $0x38] sm:$0xf0]  ;;  %v1830_v40 = vld [vmem:[%s2469_s2 + $0x34] sm:$0xf]  ;;  %v1586_v41 = vld [vmem:[%s2469_s2 + $0x3c] sm:$0xf0]  ;;  %v1629_v42 = vor.u32 %v1841_v37, %v1628_v36 }
  0x24   : > { %700 = vmatpush.bf16.msra.mxu0 %v1621_v16  ;;  %v1585_v43 = vor.u32 %v1831_v39, %v1584_v35  ;;  %v1616_v44 = vld [vmem:[%s2469_s2 + $0x68] sm:$0xf]  ;;  %v1838_v45 = vld [vmem:[%s2469_s2 + $0x70] sm:$0xf0]  ;;  %v1589_v46 = vor.u32 %v1830_v40, %v1586_v41  ;;  %v1572_v47 = vld [vmem:[%s2469_s2 + $0x18] sm:$0xf] }
  0x25   : > { %713 = vmatpush.bf16.msra.mxu1 %v1625_v17  ;;  %v1828_v48 = vld [vmem:[%s2469_s2 + $0x20] sm:$0xf0]  ;;  %v1827_v49 = vld [vmem:[%s2469_s2 + $0x1c] sm:$0xf]  ;;  %v1574_v50 = vld [vmem:[%s2469_s2 + $0x24] sm:$0xf0]  ;;  %v1617_v51 = vor.u32 %v1838_v45, %v1616_v44 }
  0x26   : > { %725 = vmatpush.bf16.msra.mxu2 %v1641_v33  ;;  %s1556_s26 = sshll.u32 %s2489_s17, 3  ;;  %v1573_v52 = vor.u32 %v1828_v48, %v1572_v47  ;;  %v1604_v53 = vld [vmem:[%s2469_s2 + $0x50] sm:$0xf]  ;;  %v1835_v54 = vld [vmem:[%s2469_s2 + $0x58] sm:$0xf0]  ;;  %v1577_v55 = vor.u32 %v1827_v49, %v1574_v50  ;;  %s2082_s27 = smov 96  }
  0x27   : > { %v1560_v56 = vld [vmem:[%s2469_s2] sm:$0xf]  ;;  %v1825_v57 = vld [vmem:[%s2469_s2 + $0x8] sm:$0xf0]  ;;  %s519_s20 = scalar_lea.vmem %s2467_s0, %s1556_s26  ;;  %v1824_v58 = vld [vmem:[%s2469_s2 + $0x4] sm:$0xf]  ;;  %v1605_v60 = vor.u32 %v1835_v54, %v1604_v53  ;;  %s526_s22 = scalar_lea.vmem %s2481_s14, %s1556_s26 }
  0x28   : > { %701 = vmatpush.bf16.msra.mxu0 %v1609_v22  ;;  %v1562_v59 = vld [vmem:[%s2469_s2 + $0xc] sm:$0xf0]  ;;  %v1561_v61 = vor.u32 %v1825_v57, %v1560_v56  ;;  %v2346_v62 = vld [vmem:[%s519_s20] sm:$0xff]  ;;  %v1592_v63 = vld [vmem:[%s2469_s2 + $0x38] sm:$0xf]  ;;  %s2083_s28 = smov 32  }
  0x29   : > { %714 = vmatpush.bf16.msra.mxu1 %v1613_v26  ;;  %v1832_v0 = vld [vmem:[%s2469_s2 + $0x40] sm:$0xf0]  ;;  %v1565_v1 = vor.u32 %v1824_v58, %v1562_v59  ;;  %v529_v2 = vpack.c.bf16 %v2346_v62, %v2346_v62  ;;  %v1580_v4 = vld [vmem:[%s2469_s2 + $0x20] sm:$0xf]  ;;  %v1829_v5 = vld [vmem:[%s2469_s2 + $0x28] sm:$0xf0] }
  0x2a   : > { %726 = vmatpush.bf16.msra.mxu2 %v1629_v42  ;;  %v1593_v3 = vor.u32 %v1832_v0, %v1592_v63  ;;  %v1581_v6 = vor.u32 %v1829_v5, %v1580_v4  ;;  %v1568_v7 = vld [vmem:[%s2469_s2 + $0x8] sm:$0xf]  ;;  %v1826_v8 = vld [vmem:[%s2469_s2 + $0x10] sm:$0xf0]  ;;  %v562_v10 = vld [vmem:[%s2470_s3] sm:$0x7] }
  0x2b   : > { %v1569_v9 = vor.u32 %v1826_v8, %v1568_v7  ;;  %v565_v11 = vperm.slane %v562_v10, 1  ;;  %v564_v14 = vperm.slane %v562_v10, 0  ;;  %v566_v23 = vperm.slane %v562_v10, 2  ;;  %v1935_v32 = vld [vmem:[%s522_s19] ss:$0 sm:$0xff] }
  0x2c   : > { %702 = vmatpush.bf16.msra.mxu0 %v1597_v34  ;;  %vm782_vm1 = vcmask 1043456   ;;  %vm766_vm2 = vcmask 64512   ;;  %vm989_vm3 = vcmask 523264   ;;  %vm991_vm4 = vcmask 785408  }
  0x2d   : > { %715 = vmatpush.bf16.msra.mxu1 %v1601_v38 }
  0x2e   : > { %727 = vmatpush.bf16.msra.mxu2 %v1617_v51 }
  0x30   : > { %703 = vmatpush.bf16.msra.mxu0 %v1585_v43 }
  0x31   : > { %716 = vmatpush.bf16.msra.mxu1 %v1589_v46 }
  0x32   : > { %728 = vmatpush.bf16.msra.mxu2 %v1605_v60 }
  0x34   : > { %704 = vmatpush.bf16.msra.mxu0 %v1573_v52 }
  0x35   : > { %717 = vmatpush.bf16.msra.mxu1 %v1577_v55 }
  0x36   : > { %729 = vmatpush.bf16.msra.mxu2 %v1593_v3 }
  0x38   : > { %705 = vmatpush.bf16.msra.mxu0 %v1561_v61 }
  0x39   : > { %718 = vmatpush.bf16.msra.mxu1 %v1565_v1 }
  0x3a   : > { %730 = vmatpush.bf16.msra.mxu2 %v1581_v6 }
  0x3b   : > { %706 = vmatmul.bf16.vlgmr.msra.gmra.mxu0 %v529_v2 }
  0x3c   : > { %719 = vmatmul.bf16.vlgmr.msra.gmra.mxu1 %v529_v2 }
  0x3e   : > { %731 = vmatpush.bf16.msra.mxu2 %v1569_v9 }
  0x41   : > { %732 = vmatmul.bf16.vlgmr.msra.gmra.mxu2 %v529_v2 }
  0xb8   : > { %v707_v12 = vpop.f32.mrf.mxu0 }
  0xb9   : > { %v720_v13 = vpop.f32.mrf.mxu1  ;;  %v708_v17 = vadd.f32 %v707_v12, %v564_v14 }
  0xba   : > { %v721_v15 = vadd.f32 %v720_v13, %v565_v11 }
  0xbb   : > { %v738_v21 = vpack.c.bf16 %v708_v17, %v708_v17 }
  0xbc   : > { %v739_v16 = vpack.c.bf16 %v721_v15, %v721_v15 }
  0xbe   : > { %862 = vrot.lane.b32.xlu2 %v739_v16, %s2081_s25  ;;  %803 = vrot.lane.b32.xlu1 %v739_v16, %s2082_s27  ;;  %v746_v18 = vsel %vm741_vm0, %v739_v16, 0 }
  0xbf   : > { %755 = vmatpush.bf16.xpose.msra.mxu3 %v746_v18 }
  0xc0   : > { %v709_v19 = vpop.f32.mrf.mxu0 }
  0xc1   : > { %v722_v20 = vpop.f32.mrf.mxu1 }
  0xc4   : > { %v733_v22 = vpop.f32.mrf.mxu2 }
  0xc5   : > { %v734_v24 = vadd.f32 %v733_v22, %v566_v23 }
  0xc6   : > { %920 = vrot.lane.b32.xlu2 %v739_v16, %s2083_s28  ;;  %800 = vrot.lane.b32.xlu1 %v738_v21, %s2082_s27 }
  0xc7   : > { %1654 = vmatmul.msk.bf16.vlgmr.msra.gmra.mxu3 %vm741_vm0, %v738_v21  ;;  %v2382_v26 = vpack.c.bf16 %v734_v24, %v734_v24 }
  0xc9   : > { %v784_v27 = vsel %vm782_vm1, %v2382_v26, 0 }
  0xca   : > { %793 = vmatpush.bf16.msrb.mxu3 %v784_v27 }
  0xcc   : > { %v735_v25 = vpop.f32.mrf.mxu2 }
  0xce   : > { %918 = vrot.lane.b32.xlu1 %v738_v21, %s2083_s28 }
 0x118   : > { %v863_v28 = vpop.permute.xlu2 %862 }
 0x119   : > { %v868_v29 = vsel %vm741_vm0, %v863_v28, 0 }
 0x11a   : > { %877 = vmatpush.bf16.xpose.msrb.mxu2 %v868_v29 }
 0x120   : > { %v921_v46 = vpop.permute.xlu2 %920 }
 0x121   : > { %v926_v48 = vsel %vm741_vm0, %v921_v46, 0  ;;  %v1854_v46 = vld [vmem:[#allocation2 + $0x30] sm:$0xff] }
 0x130   : > { %v804_v30 = vpop.permute.xlu1 %803 }
 0x131   : > { %v809_v31 = vsel %vm741_vm0, %v804_v30, 0 }
 0x132   : > { %818 = vmatpush.bf16.xpose.msra.mxu3 %v809_v31 }
 0x138   : > { %v801_v50 = vpop.permute.xlu1 %800 }
 0x140   : > { %v919_v51 = vpop.permute.xlu1 %918 }
 0x14a   : > { %v757_v33 = vpop.f32.mrf.mxu3 }
 0x14b   : > { %v761_v34 = vmul.f32 0.17677669, %v757_v33 }
 0x14d   : > { %v765_v35 = vadd.f32 %v1935_v32, %v761_v34 }
 0x14f   : > { %v767_v36 = vsel %vm766_vm2, %v765_v35, -inf }
 0x150   : > { %768 = vmax.xlane.f32.xlu0 %v767_v36 }
 0x152   : > { %v759_v37 = vpop.f32.mrf.mxu3 }
 0x1c3   : > { %v769_v38 = vpop.xlane.xlu0 %768 }
 0x1c4   : > { %v770_v39 = vsub.f32 %v765_v35, %v769_v38 }
 0x1c6   : > { %v771_v40 = vmul.f32 1.442695, %v770_v39 }
 0x1c8   : > { %1942 = vpow2.f32 %v771_v40 }
 0x1ce   : > { %v1943_v41 = vpop.eup %1942 }
 0x1cf   : > { %v773_v42 = vsel %vm766_vm2, %v1943_v41, 0.0 }
 0x1d0   : > { %774 = vadd.xlane.f32.xlu0 %v773_v42 }
 0x1e4   : > { %860 = vrot.lane.b32.xlu0 %v738_v21, %s2081_s25 }
 0x243   : > { %v775_v43 = vpop.xlane.xlu0 %774 }
 0x244   : > { %1944 = vrcp.f32 %v775_v43 }
 0x24a   : > { %v1945_v44 = vpop.eup %1944 }
 0x24b   : > { %v777_v45 = vmul.f32 %v1945_v44, %v1943_v41 }
 0x24d   : > { %v778_v47 = vpack.c.bf16 %v777_v45, %v777_v45  ;;  %v1855_v45 = vld [vmem:[#allocation2 + $0x38] sm:$0xff] }
 0x24e   : > { %1062 = vmatpush.bf16.msrb.mxu1 %v1855_v45 }
 0x24f   : > { %1655 = vmatmul.msk.bf16.vlgmr.msrb.gmra.mxu3 %vm766_vm2, %v778_v47  ;;  %v1853_v47 = vld [vmem:[#allocation2 + $0x28] sm:$0xff] }
 0x250   : > { %935 = vmatpush.bf16.xpose.msrb.mxu3 %v926_v48  ;;  %v1852_v48 = vld [vmem:[#allocation2 + $0x20] sm:$0xff] }
 0x252   : > { %1063 = vmatpush.bf16.msrb.mxu1 %v1854_v46  ;;  %v1714_v46 = vld [vmem:[#allocation4 + $0x28] sm:$0xf0] }
 0x256   : > { %v861_v49 = vpop.permute.xlu0 %860  ;;  %1064 = vmatpush.bf16.msrb.mxu1 %v1853_v47 }
 0x257   : > { %1658 = vmatmul.msk.bf16.vlgmr.msrb.gmra.mxu2 %vm741_vm0, %v861_v49  ;;  %v1851_v49 = vld [vmem:[#allocation2 + $0x18] sm:$0xff] }
 0x25a   : > { %1065 = vmatpush.bf16.msrb.mxu1 %v1852_v48  ;;  %v1704_v48 = vld [vmem:[#allocation4 + $0x10] sm:$0xf] }
 0x25e   : > { %1066 = vmatpush.bf16.msrb.mxu1 %v1851_v49  ;;  %v1859_v49 = vld [vmem:[#allocation4 + $0x14] sm:$0xf0] }
 0x25f   : > { %1656 = vmatmul.msk.bf16.vlgmr.msra.gmra.mxu3 %vm741_vm0, %v801_v50  ;;  %v1850_v50 = vld [vmem:[#allocation2 + $0x10] sm:$0xff] }
 0x262   : > { %1067 = vmatpush.bf16.msrb.mxu1 %v1850_v50  ;;  %v1858_v50 = vld [vmem:[#allocation4 + $0x14] sm:$0xf] }
 0x26f   : > { %1660 = vmatmul.msk.bf16.vlgmr.msrb.gmra.mxu3 %vm741_vm0, %v919_v51  ;;  %v1849_v51 = vld [vmem:[#allocation2 + $0x8] sm:$0xff] }
 0x270   : > { %1068 = vmatpush.bf16.msrb.mxu1 %v1849_v51  ;;  %v1705_v51 = vor.u32 %v1859_v49, %v1704_v48 }
 0x2d2   : > { %v2396_v52 = vpop.f32.mrf.mxu3 }
 0x2da   : > { %v797_v53 = vpop.f32.mrf.mxu3  ;;  %v879_v54 = vpop.f32.mrf.mxu2 }
 0x2db   : > { %v883_v55 = vmul.f32 0.17677669, %v879_v54  ;;  %v1848_v53 = vld [vmem:[#allocation2] sm:$0xff] }
 0x2dc   : > { %1069 = vmatpush.bf16.msrb.mxu1 %v1848_v53  ;;  %v1706_v53 = vld [vmem:[#allocation4 + $0x18] sm:$0xf0] }
 0x2dd   : > { %v884_v56 = vadd.f32 %v1935_v32, %v883_v55 }
 0x2df   : > { %v885_v57 = vsel %vm766_vm2, %v884_v56, -inf }
 0x2e0   : > { %886 = vmax.xlane.f32.xlu1 %v885_v57 }
 0x2e2   : > { %v820_v58 = vpop.f32.mrf.mxu3  ;;  %v881_v59 = vpop.f32.mrf.mxu2 }
 0x2e3   : > { %v824_v60 = vmul.f32 0.17677669, %v820_v58 }
 0x2e5   : > { %v825_v61 = vadd.f32 %v1935_v32, %v824_v60 }
 0x2e7   : > { %v826_v63 = vsel %vm766_vm2, %v825_v61, -inf }
 0x2e8   : > { %827 = vmax.xlane.f32.xlu2 %v826_v63 }
 0x2ea   : > { %v822_v0 = vpop.f32.mrf.mxu3 }
 0x2f2   : > { %v937_v1 = vpop.f32.mrf.mxu3 }
 0x2f3   : > { %v941_v2 = vmul.f32 0.17677669, %v937_v1 }
 0x2f5   : > { %v942_v3 = vadd.f32 %v1935_v32, %v941_v2 }
 0x2f7   : > { %v943_v4 = vsel %vm766_vm2, %v942_v3, -inf }
 0x2f8   : > { %944 = vmax.xlane.f32.xlu0 %v943_v4  ;;  %v1752_v4 = vld [vmem:[#allocation4 + $0x70] sm:$0xf] }
 0x2fa   : > { %v939_v5 = vpop.f32.mrf.mxu3 }
 0x2fb   : > { %v1871_v5 = vld [vmem:[#allocation4 + $0x74] sm:$0xf0] }
 0x30c   : > { %897 = vrot.lane.b32.xlu0 %v2382_v26, %s2081_s25 }
 0x353   : > { %v887_v6 = vpop.xlane.xlu1 %886 }
 0x354   : > { %v888_v7 = vsub.f32 %v884_v56, %v887_v6  ;;  %v1753_v6 = vor.u32 %v1871_v5, %v1752_v4 }
 0x356   : > { %v889_v8 = vmul.f32 1.442695, %v888_v7  ;;  %v1754_v7 = vld [vmem:[#allocation4 + $0x78] sm:$0xf0] }
 0x358   : > { %1946 = vpow2.f32 %v889_v8 }
 0x35b   : > { %v828_v9 = vpop.xlane.xlu2 %827 }
 0x35c   : > { %v829_v10 = vsub.f32 %v825_v61, %v828_v9  ;;  %v1936_v61 = vld [vmem:[%s2472_s5] ss:$0 sm:$0xff] }
 0x35e   : > { %v1947_v11 = vpop.eup %1946  ;;  %v830_v12 = vmul.f32 1.442695, %v829_v10 }
 0x35f   : > { %v891_v13 = vsel %vm766_vm2, %v1947_v11, 0.0 }
 0x360   : > { %1948 = vpow2.f32 %v830_v12  ;;  %892 = vadd.xlane.f32.xlu1 %v891_v13 }
 0x366   : > { %v1949_v14 = vpop.eup %1948 }
 0x367   : > { %v832_v15 = vsel %vm766_vm2, %v1949_v14, 0.0 }
 0x368   : > { %833 = vadd.xlane.f32.xlu2 %v832_v15 }
 0x36b   : > { %v945_v16 = vpop.xlane.xlu0 %944 }
 0x36c   : > { %v946_v17 = vsub.f32 %v942_v3, %v945_v16  ;;  %v2084_v3 = vmov 128.0  }
 0x36e   : > { %v947_v18 = vmul.f32 1.442695, %v946_v17 }
 0x370   : > { %1950 = vpow2.f32 %v947_v18  ;;  %v1744_v18 = vld [vmem:[#allocation4 + $0x60] sm:$0xf] }
 0x376   : > { %v1951_v19 = vpop.eup %1950 }
 0x377   : > { %v949_v20 = vsel %vm766_vm2, %v1951_v19, 0.0 }
 0x378   : > { %950 = vadd.xlane.f32.xlu1 %v949_v20  ;;  %v1868_v20 = vld [vmem:[#allocation4 + $0x64] sm:$0xf] }
 0x37e   : > { %v898_v21 = vpop.permute.xlu0 %897 }
 0x37f   : > { %v903_v22 = vsel %vm782_vm1, %v898_v21, 0 }
 0x380   : > { %839 = vrot.lane.b32.xlu2 %v2382_v26, %s2082_s27  ;;  %912 = vmatpush.bf16.msra.mxu2 %v903_v22  ;;  %v1746_v22 = vld [vmem:[#allocation4 + $0x68] sm:$0xf0] }
 0x384   : > { %1216 = vmatpush.bf16.msrb.mxu2 %v1753_v6 }
 0x391   : > { %955 = vrot.lane.b32.xlu1 %v2382_v26, %s2083_s28 }
 0x3d3   : > { %v893_v23 = vpop.xlane.xlu1 %892 }
 0x3d4   : > { %1952 = vrcp.f32 %v893_v23  ;;  %v1749_v23 = vor.u32 %v1868_v20, %v1746_v22  ;;  %v1876_v20 = vld [vmem:[#allocation6 + $0x20] sm:$0xff]  ;;  %v1883_v22 = vld [vmem:[#allocation6 + $0x58] sm:$0xff] }
 0x3da   : > { %v1953_v24 = vpop.eup %1952 }
 0x3db   : > { %v895_v25 = vmul.f32 %v1953_v24, %v1947_v11  ;;  %v834_v27 = vpop.xlane.xlu2 %833  ;;  %v1736_v24 = vld [vmem:[#allocation4 + $0x50] sm:$0xf] }
 0x3dc   : > { %1954 = vrcp.f32 %v834_v27  ;;  %v1866_v27 = vld [vmem:[#allocation4 + $0x54] sm:$0xf] }
 0x3dd   : > { %v896_v28 = vpack.c.bf16 %v895_v25, %v895_v25  ;;  %v1867_v25 = vld [vmem:[#allocation4 + $0x54] sm:$0xf0] }
 0x3df   : > { %1659 = vmatmul.msk.bf16.vlgmr.msra.gmra.mxu2 %vm766_vm2, %v896_v28  ;;  %v1737_v28 = vor.u32 %v1867_v25, %v1736_v24  ;;  %v1882_v24 = vld [vmem:[#allocation6 + $0x50] sm:$0xff]  ;;  %v1873_v25 = vld [vmem:[#allocation6 + $0x8] sm:$0xff] }
 0x3e2   : > { %v1955_v29 = vpop.eup %1954 }
 0x3e3   : > { %v836_v30 = vmul.f32 %v1955_v29, %v1949_v14  ;;  %v840_v31 = vpop.permute.xlu2 %839  ;;  %v1738_v29 = vld [vmem:[#allocation4 + $0x58] sm:$0xf0] }
 0x3e4   : > { %v845_v32 = vsel %vm782_vm1, %v840_v31, 0  ;;  %v1728_v31 = vld [vmem:[#allocation4 + $0x40] sm:$0xf] }
 0x3e5   : > { %854 = vmatpush.bf16.msrb.mxu0 %v845_v32  ;;  %v837_v33 = vpack.c.bf16 %v836_v30, %v836_v30  ;;  %v1741_v30 = vor.u32 %v1866_v27, %v1738_v29  ;;  %v1865_v32 = vld [vmem:[#allocation4 + $0x44] sm:$0xf0]  ;;  %v1880_v29 = vld [vmem:[#allocation6 + $0x40] sm:$0xff] }
 0x3e6   : > { %v1881_v27 = vld [vmem:[#allocation6 + $0x48] sm:$0xff] }
 0x3e8   : > { %1657 = vmatmul.msk.bf16.vlgmr.msrb.gmra.mxu0 %vm766_vm2, %v837_v33  ;;  %v1864_v33 = vld [vmem:[#allocation4 + $0x44] sm:$0xf] }
 0x3eb   : > { %v951_v34 = vpop.xlane.xlu1 %950 }
 0x3ec   : > { %1956 = vrcp.f32 %v951_v34  ;;  %v1729_v34 = vor.u32 %v1865_v32, %v1728_v31 }
 0x3ed   : > { %1958 = vrcp.f32 %v2084_v3  ;;  %v1886_v3 = vld [vmem:[#allocation6 + $0x70] sm:$0xff] }
 0x3f2   : > { %v1957_v26 = vpop.eup %1956 }
 0x3f3   : > { %v953_v35 = vmul.f32 %v1957_v26, %v1951_v19  ;;  %v1959_v9 = vpop.eup %1958  ;;  %v1869_v19 = vld [vmem:[#allocation4 + $0x64] sm:$0xf0]  ;;  %v1730_v26 = vld [vmem:[#allocation4 + $0x48] sm:$0xf0] }
 0x3f4   : > { %v1081_v10 = vmul.f32 128.0, %v1959_v9  ;;  %vm1085_vm5 = vweird.f32 %v1959_v9  ;;  %v1745_v21 = vor.u32 %v1869_v19, %v1744_v18  ;;  %v1877_v18 = vld [vmem:[#allocation6 + $0x28] sm:$0xff] }
 0x3f5   : > { %v954_v38 = vpack.c.bf16 %v953_v35, %v953_v35  ;;  %v1733_v35 = vor.u32 %v1864_v33, %v1730_v26  ;;  %v1885_v19 = vld [vmem:[#allocation6 + $0x68] sm:$0xff] }
 0x3f6   : > { %v1082_v11 = vsub.f32 1.0, %v1081_v10  ;;  %1217 = vmatpush.bf16.msrb.mxu2 %v1745_v21  ;;  %v1937_v10 = vld [vmem:[%s2473_s6] ss:$0 sm:$0xff] }
 0x3f7   : > { %v1884_v21 = vld [vmem:[#allocation6 + $0x60] sm:$0xff] }
 0x3f8   : > { %v1083_v12 = vmul.f32 %v1959_v9, %v1082_v11 }
 0x3fa   : > { %v1084_v13 = vadd.f32 %v1959_v9, %v1083_v12  ;;  %1218 = vmatpush.bf16.msrb.mxu2 %v1737_v28  ;;  %v1872_v28 = vld [vmem:[#allocation6] sm:$0xff] }
 0x3fc   : > { %v2425_v14 = vsel %vm1085_vm5, %v1959_v9, %v1084_v13  ;;  %v1938_v13 = vld [vmem:[%s2474_s7] ss:$0 sm:$0xff] }
 0x3fe   : > { %1219 = vmatpush.bf16.msrb.mxu2 %v1729_v34 }
 0x403   : > { %v956_v36 = vpop.permute.xlu1 %955 }
 0x404   : > { %v961_v37 = vsel %vm782_vm1, %v956_v36, 0  ;;  %v1720_v36 = vld [vmem:[#allocation4 + $0x30] sm:$0xf] }
 0x405   : > { %970 = vmatpush.bf16.msra.mxu0 %v961_v37  ;;  %v1863_v37 = vld [vmem:[#allocation4 + $0x34] sm:$0xf0] }
 0x408   : > { %1661 = vmatmul.msk.bf16.vlgmr.msra.gmra.mxu0 %vm766_vm2, %v954_v38  ;;  %v1862_v38 = vld [vmem:[#allocation4 + $0x34] sm:$0xf] }
 0x462   : > { %v914_v39 = vpop.f32.mrf.mxu2 }
 0x465   : > { %v856_v40 = vpop.f32.mrf.mxu0 }
 0x466   : > { %977 = vrot.lane.b32.xlu2 %v856_v40, %s2083_s28  ;;  %v1722_v40 = vld [vmem:[#allocation4 + $0x38] sm:$0xf0] }
 0x46a   : > { %v916_v41 = vpop.f32.mrf.mxu2 }
 0x46b   : > { %v1725_v41 = vor.u32 %v1862_v38, %v1722_v40 }
 0x46d   : > { %v858_v42 = vpop.f32.mrf.mxu0 }
 0x46e   : > { %981 = vrot.lane.b32.xlu2 %v914_v39, %s2081_s25  ;;  %v1721_v39 = vor.u32 %v1863_v37, %v1720_v36  ;;  %v1712_v42 = vld [vmem:[#allocation4 + $0x20] sm:$0xf] }
 0x470   : > { %1220 = vmatpush.bf16.msrb.mxu2 %v1721_v39 }
 0x485   : > { %v972_v43 = vpop.f32.mrf.mxu0 }
 0x486   : > { %985 = vrot.lane.b32.xlu0 %v972_v43, %s2082_s27  ;;  %v1861_v43 = vld [vmem:[#allocation4 + $0x24] sm:$0xf0] }
 0x487   : > { %v1713_v45 = vor.u32 %v1861_v43, %v1712_v42 }
 0x489   : > { %1221 = vmatpush.bf16.msrb.mxu2 %v1713_v45 }
 0x48d   : > { %v974_v44 = vpop.f32.mrf.mxu0  ;;  %1222 = vmatpush.bf16.msrb.mxu2 %v1705_v51 }
 0x48e   : > { %v1860_v44 = vld [vmem:[#allocation4 + $0x24] sm:$0xf] }
 0x48f   : > { %v1717_v47 = vor.u32 %v1860_v44, %v1714_v46 }
 0x4c0   : > { %v978_v54 = vpop.permute.xlu2 %977 }
 0x4c1   : > { %v988_v56 = vsel %vm741_vm0, %v2396_v52, %v978_v54  ;;  %v1870_v52 = vld [vmem:[#allocation4 + $0x74] sm:$0xf]  ;;  %v1696_v54 = vld [vmem:[#allocation4] sm:$0xf] }
 0x4c2   : > { %v1757_v8 = vor.u32 %v1870_v52, %v1754_v7 }
 0x4c4   : > { %1229 = vmatpush.bf16.msra.mxu3 %v1757_v8 }
 0x4c8   : > { %v982_v55 = vpop.permute.xlu2 %981  ;;  %1230 = vmatpush.bf16.msra.mxu3 %v1749_v23  ;;  %v1874_v23 = vld [vmem:[#allocation6 + $0x10] sm:$0xff] }
 0x4c9   : > { %v990_v57 = vsel %vm989_vm3, %v988_v56, %v982_v55  ;;  %v1857_v55 = vld [vmem:[#allocation4 + $0x4] sm:$0xf0]  ;;  %v1709_v56 = vor.u32 %v1858_v50, %v1706_v53 }
 0x4cc   : > { %1231 = vmatpush.bf16.msra.mxu3 %v1741_v30  ;;  %v1130_v30 = vld [vmem:[%s2476_s9] sm:$0x3] }
 0x4cd   : > { %v1132_v31 = vperm.slane %v1130_v30, 0  ;;  %v1133_v32 = vperm.slane %v1130_v30, 1 }
 0x4d0   : > { %1232 = vmatpush.bf16.msra.mxu3 %v1733_v35 }
 0x4d4   : > { %1233 = vmatpush.bf16.msra.mxu3 %v1725_v41 }
 0x4d8   : > { %1234 = vmatpush.bf16.msra.mxu3 %v1717_v47 }
 0x4dc   : > { %1235 = vmatpush.bf16.msra.mxu3 %v1709_v56 }
 0x4f8   : > { %v986_v58 = vpop.permute.xlu0 %985 }
 0x4f9   : > { %v992_v59 = vsel %vm991_vm4, %v990_v57, %v986_v58  ;;  %v1856_v57 = vld [vmem:[#allocation4 + $0x4] sm:$0xf]  ;;  %v1698_v58 = vld [vmem:[#allocation4 + $0x8] sm:$0xf0] }
 0x4fa   : > { %v993_v60 = vpack.c.bf16 %v992_v59, %v992_v59  ;;  %v1697_v59 = vor.u32 %v1857_v55, %v1696_v54 }
 0x4fc   : > { %1070 = vmatmul.bf16.vlgmr.msrb.gmra.mxu1 %v993_v60  ;;  %v1701_v60 = vor.u32 %v1856_v57, %v1698_v58  ;;  %1223 = vmatpush.bf16.msrb.mxu2 %v1697_v59  ;;  %v1939_v59 = vld [vmem:[%s2478_s11] ss:$0 sm:$0xff] }
 0x4fe   : > { %1236 = vmatpush.bf16.msra.mxu3 %v1701_v60 }
 0x579   : > { %v1071_v63 = vpop.f32.mrf.mxu1 }
 0x57a   : > { %v1072_v0 = vadd.f32 %v1936_v61, %v1071_v63  ;;  %v1879_v61 = vld [vmem:[#allocation6 + $0x38] sm:$0xff] }
 0x57b   : > { %v1887_v63 = vld [vmem:[#allocation6 + $0x78] sm:$0xff]  ;;  %1394 = vmatpush.bf16.msrb.mxu0 %v1879_v61 }
 0x57c   : > { %v1075_v1 = vadd.f32 %v1072_v0, %v2346_v62  ;;  %1407 = vmatpush.bf16.msra.mxu1 %v1887_v63 }
 0x57e   : > { %1078 = vadd.xlane.f32.xlu2 %v1075_v1 }
 0x580   : > { %1408 = vmatpush.bf16.msra.mxu1 %v1886_v3 }
 0x581   : > { %v1073_v2 = vpop.f32.mrf.mxu1 }
 0x582   : > { %v1878_v2 = vld [vmem:[#allocation6 + $0x30] sm:$0xff] }
 0x583   : > { %1395 = vmatpush.bf16.msrb.mxu0 %v1878_v2 }
 0x584   : > { %1409 = vmatpush.bf16.msra.mxu1 %v1885_v19 }
 0x587   : > { %1396 = vmatpush.bf16.msrb.mxu0 %v1877_v18 }
 0x588   : > { %1410 = vmatpush.bf16.msra.mxu1 %v1884_v21 }
 0x58b   : > { %1397 = vmatpush.bf16.msrb.mxu0 %v1876_v20 }
 0x58c   : > { %1411 = vmatpush.bf16.msra.mxu1 %v1883_v22 }
 0x590   : > { %1412 = vmatpush.bf16.msra.mxu1 %v1882_v24 }
 0x594   : > { %1413 = vmatpush.bf16.msra.mxu1 %v1881_v27 }
 0x598   : > { %1414 = vmatpush.bf16.msra.mxu1 %v1880_v29 }
 0x5f1   : > { %v1079_v62 = vpop.xlane.xlu2 %1078 }
 0x5f2   : > { %v1087_v15 = vmul.f32 %v2425_v14, %v1079_v62 }
 0x5f4   : > { %v2428_v16 = vsub.f32 %v1075_v1, %v1087_v15 }
 0x5f6   : > { %v1089_v17 = vmul.f32 %v2428_v16, %v2428_v16 }
 0x5f8   : > { %1090 = vadd.xlane.f32.xlu0 %v1089_v17 }
 0x66b   : > { %v1091_v0 = vpop.xlane.xlu0 %1090 }
 0x66c   : > { %v1092_v1 = vmul.f32 %v1091_v0, %v2425_v14 }
 0x66e   : > { %v1093_v4 = vadd.f32 1e-12, %v1092_v1 }
 0x670   : > { %1960 = vrsqrt.f32 %v1093_v4  ;;  %vm1100_vm7 = vweird.f32 %v1093_v4 }
 0x676   : > { %v1961_v5 = vpop.eup %1960 }
 0x677   : > { %v1095_v52 = vmul.f32 %v1961_v5, %v1093_v4  ;;  %vm1101_vm6 = vweird.f32 %v1961_v5 }
 0x678   : > { %vm1102_vm8 = vmor %vm1100_vm7, %vm1101_vm6 }
 0x679   : > { %v1096_v6 = vmul.f32 %v1961_v5, %v1095_v52 }
 0x67b   : > { %v1097_v7 = vmul.f32 0.5, %v1096_v6 }
 0x67d   : > { %v1098_v8 = vsub.f32 1.5, %v1097_v7 }
 0x67f   : > { %v1099_v9 = vmul.f32 %v1961_v5, %v1098_v8 }
 0x681   : > { %v1103_v11 = vsel %vm1102_vm8, %v1961_v5, %v1099_v9 }
 0x682   : > { %v1104_v12 = vmul.f32 %v1103_v11, %v2428_v16  ;;  %v1875_v16 = vld [vmem:[#allocation6 + $0x18] sm:$0xff] }
 0x683   : > { %1398 = vmatpush.bf16.msrb.mxu0 %v1875_v16 }
 0x684   : > { %v1108_v62 = vmul.f32 %v1937_v10, %v1104_v12 }
 0x686   : > { %v2440_v15 = vadd.f32 %v1938_v13, %v1108_v62 }
 0x687   : > { %1399 = vmatpush.bf16.msrb.mxu0 %v1874_v23 }
 0x688   : > { %v1113_v17 = vpack.c.bf16 %v2440_v15, %v2440_v15 }
 0x68a   : > { %1224 = vmatmul.bf16.vlgmr.msrb.gmra.mxu2 %v1113_v17  ;;  %1237 = vmatmul.bf16.vlgmr.msra.gmra.mxu3 %v1113_v17  ;;  %v1940_v17 = vld [vmem:[%s2479_s12] ss:$0 sm:$0xff] }
 0x68b   : > { %1400 = vmatpush.bf16.msrb.mxu0 %v1873_v25 }
 0x68f   : > { %1401 = vmatpush.bf16.msrb.mxu0 %v1872_v28 }
 0x70d   : > { %v1225_v33 = vpop.f32.mrf.mxu2  ;;  %v1238_v34 = vpop.f32.mrf.mxu3 }
 0x70e   : > { %v1226_v26 = vadd.f32 %v1225_v33, %v1132_v31  ;;  %v1239_v35 = vadd.f32 %v1238_v34, %v1133_v32 }
 0x710   : > { %v1244_v36 = vmul.f32 0.044715, %v1226_v26  ;;  %v1245_v37 = vmul.f32 0.044715, %v1239_v35  ;;  %v1242_v50 = vmul.f32 0.5, %v1226_v26  ;;  %v1243_v53 = vmul.f32 0.5, %v1239_v35 }
 0x712   : > { %v1246_v38 = vmul.f32 %v1244_v36, %v1226_v26  ;;  %v1247_v39 = vmul.f32 %v1245_v37, %v1239_v35 }
 0x714   : > { %v1248_v40 = vmul.f32 %v1246_v38, %v1226_v26  ;;  %v1249_v41 = vmul.f32 %v1247_v39, %v1239_v35 }
 0x715   : > { %v1227_v42 = vpop.f32.mrf.mxu2  ;;  %v1240_v43 = vpop.f32.mrf.mxu3 }
 0x716   : > { %v1250_v44 = vadd.f32 %v1248_v40, %v1226_v26  ;;  %v1251_v45 = vadd.f32 %v1249_v41, %v1239_v35 }
 0x718   : > { %v1252_v46 = vmul.f32 0.7978846, %v1250_v44  ;;  %v1253_v47 = vmul.f32 0.7978846, %v1251_v45 }
 0x71a   : > { %1962 = vtanh.f32 %v1252_v46 }
 0x71b   : > { %1964 = vtanh.f32 %v1253_v47 }
 0x720   : > { %v1963_v48 = vpop.eup %1962 }
 0x721   : > { %v1965_v49 = vpop.eup %1964  ;;  %v1256_v51 = vadd.f32 1.0, %v1963_v48 }
 0x722   : > { %v1257_v54 = vadd.f32 1.0, %v1965_v49 }
 0x723   : > { %v1258_v55 = vmul.f32 %v1256_v51, %v1242_v50 }
 0x724   : > { %v1259_v56 = vmul.f32 %v1257_v54, %v1243_v53 }
 0x725   : > { %v1260_v57 = vpack.c.bf16 %v1258_v55, %v1258_v55 }
 0x726   : > { %v1261_v58 = vpack.c.bf16 %v1259_v56, %v1259_v56 }
 0x727   : > { %1402 = vmatmul.bf16.vlgmr.msrb.gmra.mxu0 %v1260_v57 }
 0x728   : > { %1415 = vmatmul.bf16.vlgmr.msra.gmra.mxu1 %v1261_v58 }
 0x7a4   : > { %v1403_v60 = vpop.f32.mrf.mxu0 }
 0x7a5   : > { %v1404_v61 = vadd.f32 %v1939_v59, %v1403_v60  ;;  %v1416_v63 = vpop.f32.mrf.mxu1 }
 0x7a7   : > { %v1417_v0 = vadd.f32 %v1416_v63, %v1404_v61 }
 0x7a9   : > { %v1420_v1 = vadd.f32 %v1417_v0, %v2440_v15 }
 0x7ab   : > { %1423 = vadd.xlane.f32.xlu1 %v1420_v1 }
 0x7ac   : > { %v1405_v2 = vpop.f32.mrf.mxu0 }
 0x7ad   : > { %v1418_v3 = vpop.f32.mrf.mxu1 }
 0x81e   : > { %v1424_v4 = vpop.xlane.xlu1 %1423 }
 0x81f   : > { %v1425_v5 = vmul.f32 %v1424_v4, %v2425_v14 }
 0x821   : > { %v1426_v52 = vsub.f32 %v1420_v1, %v1425_v5 }
 0x823   : > { %v1427_v6 = vmul.f32 %v1426_v52, %v1426_v52 }
 0x825   : > { %1428 = vadd.xlane.f32.xlu2 %v1427_v6 }
 0x898   : > { %v1429_v7 = vpop.xlane.xlu2 %1428 }
 0x899   : > { %v1430_v8 = vmul.f32 %v1429_v7, %v2425_v14  ;;  %v1941_v14 = vld [vmem:[%s2480_s13] ss:$0 sm:$0xff] }
 0x89b   : > { %v1431_v9 = vadd.f32 1e-12, %v1430_v8 }
 0x89d   : > { %1966 = vrsqrt.f32 %v1431_v9  ;;  %vm1438_vm10 = vweird.f32 %v1431_v9 }
 0x8a3   : > { %v1967_v10 = vpop.eup %1966 }
 0x8a4   : > { %v1433_v11 = vmul.f32 %v1967_v10, %v1431_v9  ;;  %vm1439_vm9 = vweird.f32 %v1967_v10 }
 0x8a5   : > { %vm1440_vm11 = vmor %vm1438_vm10, %vm1439_vm9 }
 0x8a6   : > { %v1434_v12 = vmul.f32 %v1967_v10, %v1433_v11 }
 0x8a8   : > { %v1435_v13 = vmul.f32 0.5, %v1434_v12 }
 0x8aa   : > { %v1436_v62 = vsub.f32 1.5, %v1435_v13 }
 0x8ac   : > { %v1437_v15 = vmul.f32 %v1967_v10, %v1436_v62 }
 0x8ae   : > { %v1441_v18 = vsel %vm1440_vm11, %v1967_v10, %v1437_v15 }
 0x8af   : > { %v1442_v19 = vmul.f32 %v1441_v18, %v1426_v52 }
 0x8b1   : > { %v1446_v20 = vmul.f32 %v1940_v17, %v1442_v19 }
 0x8b3   : > { %v1450_v21 = vadd.f32 %v1941_v14, %v1446_v20 }
 0x8b5   : > { %1451 = vst [vmem:[%s526_s22] sm:$0xff] %v1450_v21 }
 0x8b6 PF: > { %s26_s29 = sadd.s32 1, %s2072_s29  }
 0x8b7   : > { %p23_p7 = scmp.ge.s32.totalorder %s26_s29, 4  }
 0x8b9   :  { %25 = sbr.rel (!%p23_p7) target bundleno = 5 (0x5), region = 122 }
 0x8be   :  { %1471 = vsyncpa [#allocation3], 1 }
 0x8bf   :  { %1473 = vsyncpa [#allocation3 + $0x1], 1 }
 0x8c0   :  { %1474 = vsyncpa [#allocation5], 1 }

</bundles_post_ra>
